<compile_context>
chip_gen: v6e
topology: v6e:2x2x1
jax: 0.10.0
libtpu: 0.0.40
codegen_flags: <defaults>
</compile_context>

<pallas_src>
import functools

import jax
import jax.numpy as jnp
from jax.experimental import pallas as pl


LANE = 128  # classifier logits padded to one full vreg lane width


# -------------------- helpers traced inside the kernel ----------------------

def _layernorm(x, gamma, beta, eps):
    mean = jnp.mean(x, axis=-1, keepdims=True)
    var = jnp.mean((x - mean) ** 2, axis=-1, keepdims=True)
    return (x - mean) * jax.lax.rsqrt(var + eps) * gamma + beta


def _gelu(x):
    # tanh-approx GELU (rides the EUP slot instead of a VPU erf polynomial).
    c = 0.7978845608028654  # sqrt(2/pi)
    return 0.5 * x * (1.0 + jnp.tanh(c * (x + 0.044715 * x * x * x)))


# ----------------------------- the fused kernel ------------------------------

def _fused_forward_kernel(x_ref, mask_ref,
                          eg_ref, eb_ref,
                          wqkv_ref, bqkv_ref, wo_ref, bo_ref, g1_ref, b1_ref,
                          wi_ref, bi_ref, wf_ref, bf_ref, g2_ref, b2_ref,
                          wd_ref, bd_ref, wc_ref, bc_ref,
                          logits_ref,
                          *, batch, seq, num_heads, head_dim, num_layers,
                          scale, eps):
    """Embedding LN + all encoder layers + classification head, one invocation."""
    H = num_heads * head_dim

    # --- embedding LayerNorm (residual-free) ---
    x = _layernorm(x_ref[...].astype(jnp.float32), eg_ref[...], eb_ref[...], eps)  # (B*S, H)

    add_mask = mask_ref[...]                 # (1, B*S, B*S) additive block-diag mask

    def split_heads(m):                      # (B*S, H) -> (nH, B*S, Dh)
        # Only static lane slices + a leading-dim stack: Dh stays in the lane dim.
        return jnp.stack(
            [m[:, h * head_dim:(h + 1) * head_dim] for h in range(num_heads)],
            axis=0)

    for l in range(num_layers):
        # --- fused QKV projection: one (B*S,H) @ (H,3H) MXU matmul ---
        qkv = (jnp.dot(x, wqkv_ref[l].astype(jnp.float32),
                       preferred_element_type=jnp.float32)
               + bqkv_ref[l])                                        # (B*S, 3H)
        # TODO(synk): at production shapes feed the MXU bf16 operands
        #             (bf16 weights + bf16-cast activations, f32 accumulate).
        q = split_heads(qkv[:, 0:H])
        k = split_heads(qkv[:, H:2 * H])
        v = split_heads(qkv[:, 2 * H:3 * H])

        # --- heads-batched attention over the packed (B*S) key axis.
        # The block-diagonal additive mask kills cross-batch and padded keys.
        s = jnp.einsum('hqd,hkd->hqk', q, k,
                       preferred_element_type=jnp.float32) * scale + add_mask
        s = s - jnp.max(s, axis=-1, keepdims=True)
        p = jnp.exp(s)
        p = p * pl.reciprocal(jnp.sum(p, axis=-1, keepdims=True), approx=True)
        ctx = jnp.einsum('hqk,hkd->hqd', p, v,
                         preferred_element_type=jnp.float32)          # (nH, B*S, Dh)

        # merge heads on the lane dim, then ONE output projection with K = H
        ctx = jnp.concatenate([ctx[h] for h in range(num_heads)], axis=-1)  # (B*S, H)
        attn = (jnp.dot(ctx, wo_ref[l].astype(jnp.float32),
                        preferred_element_type=jnp.float32) + bo_ref[l])

        # --- residual + LayerNorm (attention block epilogue) ---
        h1 = _layernorm(attn + x, g1_ref[l], b1_ref[l], eps)

        # --- FFN: dense -> GELU -> dense, residual + LayerNorm ---
        inter = _gelu(jnp.dot(h1, wi_ref[l].astype(jnp.float32),
                              preferred_element_type=jnp.float32) + bi_ref[l])
        ffn = (jnp.dot(inter, wf_ref[l].astype(jnp.float32),
                       preferred_element_type=jnp.float32) + bf_ref[l])
        x = _layernorm(ffn + h1, g2_ref[l], b2_ref[l], eps)

    # --- classification head: <s> token of each batch element ---
    cls = jnp.concatenate([x[b * seq:b * seq + 1, :] for b in range(batch)],
                          axis=0)                                     # (B, H)
    z = jnp.tanh(jnp.dot(cls, wd_ref[...].astype(jnp.float32),
                         preferred_element_type=jnp.float32) + bd_ref[...])
    logits = (jnp.dot(z, wc_ref[...].astype(jnp.float32),
                      preferred_element_type=jnp.float32) + bc_ref[...])  # (B, 128)
    logits_ref[...] = logits.astype(logits_ref.dtype)


def fused_forward(x, add_mask, packed, cfg, *, batch, seq):
    """x: (B*S, H) embedding sum; add_mask: (1, B*S, B*S). -> (B, 128) padded logits."""
    H, I = cfg.hidden, cfg.intermediate
    nH = cfg.num_heads
    Dh = H // nH
    nL = cfg.num_layers
    BS = batch * seq
    scale = 1.0 / (Dh ** 0.5)

    def full(shape):
        nd = len(shape)
        return pl.BlockSpec(shape, lambda *_: (0,) * nd)

    kernel = functools.partial(
        _fused_forward_kernel, batch=batch, seq=seq, num_heads=nH, head_dim=Dh,
        num_layers=nL, scale=scale, eps=cfg.layer_norm_eps)

    return pl.pallas_call(
        kernel,
        out_shape=jax.ShapeDtypeStruct((batch, LANE), jnp.float32),
        in_specs=[
            full((BS, H)),                                  # embeddings
            full((1, BS, BS)),                              # additive block-diag mask
            full((1, H)), full((1, H)),                     # embedding LN
            full((nL, H, 3 * H)), full((nL, 1, 3 * H)),     # fused QKV (stacked)
            full((nL, H, H)), full((nL, 1, H)),             # attn output proj
            full((nL, 1, H)), full((nL, 1, H)),             # attn LN gamma/beta
            full((nL, H, I)), full((nL, 1, I)),             # ffn in
            full((nL, I, H)), full((nL, 1, H)),             # ffn out
            full((nL, 1, H)), full((nL, 1, H)),             # ffn LN gamma/beta
            full((H, H)), full((1, H)),                     # cls dense
            full((H, LANE)), full((1, LANE)),               # cls out (lane-padded)
        ],
        out_specs=full((batch, LANE)),
    )(x, add_mask,
      packed["emb_ln_g"], packed["emb_ln_b"],
      packed["wqkv"], packed["bqkv"], packed["wo"], packed["bo"],
      packed["g1"], packed["b1"],
      packed["wi"], packed["bi"], packed["wf"], packed["bf"],
      packed["g2"], packed["b2"],
      packed["cls_wd"], packed["cls_bd"], packed["cls_wo"], packed["cls_bo"])


# ------------------------------ Model (glue) ---------------------------------

class Config:
    vocab_size = 128          # (50265 in the real model)
    max_position_embeddings = 16
    type_vocab_size = 1
    hidden = 32
    num_heads = 4
    num_layers = 2
    intermediate = 64
    num_labels = 2
    pad_token_id = 1
    layer_norm_eps = 1e-5


def init_params(key, cfg):
    def dense(k, din, dout):
        kw, kb = jax.random.split(k)
        return {"w": 0.02 * jax.random.normal(kw, (din, dout), jnp.float32),
                "b": 0.02 * jax.random.normal(kb, (dout,), jnp.float32)}

    keys = iter(jax.random.split(key, 64))
    H, I = cfg.hidden, cfg.intermediate
    params = {
        "word_emb": 0.02 * jax.random.normal(next(keys), (cfg.vocab_size, H), jnp.float32),
        "pos_emb": 0.02 * jax.random.normal(next(keys), (cfg.max_position_embeddings, H), jnp.float32),
        "type_emb": 0.02 * jax.random.normal(next(keys), (cfg.type_vocab_size, H), jnp.float32),
        "emb_ln_g": jnp.ones((H,), jnp.float32),
        "emb_ln_b": jnp.zeros((H,), jnp.float32),
        "layers": [],
        "cls_dense": dense(next(keys), H, H),
        "cls_out": dense(next(keys), H, cfg.num_labels),
    }
    for _ in range(cfg.num_layers):
        params["layers"].append({
            "q": dense(next(keys), H, H),
            "k": dense(next(keys), H, H),
            "v": dense(next(keys), H, H),
            "attn_out": dense(next(keys), H, H),
            "attn_ln_g": jnp.ones((H,), jnp.float32),
            "attn_ln_b": jnp.zeros((H,), jnp.float32),
            "ffn_in": dense(next(keys), H, I),
            "ffn_out": dense(next(keys), I, H),
            "ffn_ln_g": jnp.ones((H,), jnp.float32),
            "ffn_ln_b": jnp.zeros((H,), jnp.float32),
        })
    return params


def pack_params(params, cfg):
    """One-time weight packing: QKV concat, layer stacking, bias/LN reshapes,
    classifier logits padded to 128 lanes. Run once, outside the forward."""
    H, I = cfg.hidden, cfg.intermediate

    def stack(fn):
        return jnp.stack([fn(lp) for lp in params["layers"]], axis=0)

    wc = jnp.zeros((H, LANE), jnp.float32).at[:, :cfg.num_labels].set(params["cls_out"]["w"])
    bc = jnp.zeros((1, LANE), jnp.float32).at[0, :cfg.num_labels].set(params["cls_out"]["b"])

    return {
        "word_emb": params["word_emb"],
        "pos_emb": params["pos_emb"],
        "type_emb": params["type_emb"],
        "emb_ln_g": params["emb_ln_g"].reshape(1, H),
        "emb_ln_b": params["emb_ln_b"].reshape(1, H),
        "wqkv": stack(lambda p: jnp.concatenate(
            [p["q"]["w"], p["k"]["w"], p["v"]["w"]], axis=1)),          # (nL, H, 3H)
        "bqkv": stack(lambda p: jnp.concatenate(
            [p["q"]["b"], p["k"]["b"], p["v"]["b"]]).reshape(1, 3 * H)),
        "wo": stack(lambda p: p["attn_out"]["w"]),
        "bo": stack(lambda p: p["attn_out"]["b"].reshape(1, H)),
        "g1": stack(lambda p: p["attn_ln_g"].reshape(1, H)),
        "b1": stack(lambda p: p["attn_ln_b"].reshape(1, H)),
        "wi": stack(lambda p: p["ffn_in"]["w"]),
        "bi": stack(lambda p: p["ffn_in"]["b"].reshape(1, I)),
        "wf": stack(lambda p: p["ffn_out"]["w"]),
        "bf": stack(lambda p: p["ffn_out"]["b"].reshape(1, H)),
        "g2": stack(lambda p: p["ffn_ln_g"].reshape(1, H)),
        "b2": stack(lambda p: p["ffn_ln_b"].reshape(1, H)),
        "cls_wd": params["cls_dense"]["w"],
        "cls_bd": params["cls_dense"]["b"].reshape(1, H),
        "cls_wo": wc,
        "cls_bo": bc,
    }


def longformer_forward(packed, input_ids, labels, padding_mask, cfg):
    B, S = input_ids.shape
    H = cfg.hidden

    # --- embeddings (gathers in plain JAX; everything else in the Pallas kernel) ---
    mask_f = padding_mask.astype(jnp.float32)
    # RoBERTa-style position ids (padding_idx = pad_token_id = 1)
    pos_ids = (jnp.cumsum(padding_mask, axis=1) * padding_mask) + cfg.pad_token_id
    emb = (packed["word_emb"][input_ids]
           + packed["pos_emb"][pos_ids]
           + packed["type_emb"][0][None, None, :])                     # (B, S, H)
    x = emb.reshape(B * S, H)

    # Block-diagonal additive mask over the packed (B*S) key axis:
    # key j is visible to query i iff same batch element AND not padding.
    same_batch = jnp.kron(jnp.eye(B, dtype=jnp.float32),
                          jnp.ones((S, S), jnp.float32))               # (B*S, B*S)
    key_valid = mask_f.reshape(1, B * S)
    add_mask = ((1.0 - same_batch * key_valid) * -1e9).reshape(1, B * S, B * S)

    # --- single fused Pallas call: emb LN + all layers + classifier head ---
    logits_padded = fused_forward(x, add_mask, packed, cfg, batch=B, seq=S)
    logits = logits_padded[:, :cfg.num_labels]                         # (B, num_labels)

    # --- cross-entropy loss (tiny; plain JAX) ---
    logp = jax.nn.log_softmax(logits, axis=-1)
    loss = -jnp.mean(jnp.take_along_axis(logp, labels[:, None], axis=-1))
    return {"loss": loss, "logits": logits}


# --------------------------------- main --------------------------------------

if __name__ == "__main__":
    cfg = Config()
    B, S = 2, 8

    key = jax.random.PRNGKey(0)
    k_par, k_ids = jax.random.split(key)
    params = init_params(k_par, cfg)
    packed = pack_params(params, cfg)        # one-time packing (not per forward)

    input_ids = jax.random.randint(k_ids, (B, S), 2, cfg.vocab_size, dtype=jnp.int32)
    padding_mask = jnp.ones((B, S), dtype=jnp.int32)
    padding_mask = padding_mask.at[1, S - 2:].set(0)                   # pad tail of sample 1
    input_ids = jnp.where(padding_mask == 1, input_ids, cfg.pad_token_id)
    labels = jnp.array([0, 1], dtype=jnp.int32)

    fwd = jax.jit(functools.partial(longformer_forward, cfg=cfg))
    out = fwd(packed, input_ids, labels, padding_mask)
    jax.block_until_ready(out)

    assert out["logits"].shape == (B, cfg.num_labels)
    assert out["loss"].shape == ()
    print("KERNEL_OK")
</pallas_src>

<mosaic_0001>
module attributes {stable_mosaic.version = 11 : i64} {
  func.func @_fused_forward_kernel(%arg0: memref<16x32xf32, #tpu.memory_space<vmem>>, %arg1: memref<1x16x16xf32, #tpu.memory_space<vmem>>, %arg2: memref<1x32xf32, #tpu.memory_space<vmem>>, %arg3: memref<1x32xf32, #tpu.memory_space<vmem>>, %arg4: memref<2x32x96xf32, #tpu.memory_space<vmem>>, %arg5: memref<2x1x96xf32, #tpu.memory_space<vmem>>, %arg6: memref<2x32x32xf32, #tpu.memory_space<vmem>>, %arg7: memref<2x1x32xf32, #tpu.memory_space<vmem>>, %arg8: memref<2x1x32xf32, #tpu.memory_space<vmem>>, %arg9: memref<2x1x32xf32, #tpu.memory_space<vmem>>, %arg10: memref<2x32x64xf32, #tpu.memory_space<vmem>>, %arg11: memref<2x1x64xf32, #tpu.memory_space<vmem>>, %arg12: memref<2x64x32xf32, #tpu.memory_space<vmem>>, %arg13: memref<2x1x32xf32, #tpu.memory_space<vmem>>, %arg14: memref<2x1x32xf32, #tpu.memory_space<vmem>>, %arg15: memref<2x1x32xf32, #tpu.memory_space<vmem>>, %arg16: memref<32x32xf32, #tpu.memory_space<vmem>>, %arg17: memref<1x32xf32, #tpu.memory_space<vmem>>, %arg18: memref<32x128xf32, #tpu.memory_space<vmem>>, %arg19: memref<1x128xf32, #tpu.memory_space<vmem>>, %arg20: memref<2x128xf32, #tpu.memory_space<vmem>>) attributes {dimension_semantics = [], scalar_prefetch = 0 : i64, scratch_operands = 0 : i64, tpu.core_type = #tpu.core_type<tc>} {
    %c0 = arith.constant 0 : index
    %c0_0 = arith.constant 0 : index
    %0 = vector.load %arg0[%c0, %c0_0] : memref<16x32xf32, #tpu.memory_space<vmem>>, vector<16x32xf32>
    %c0_1 = arith.constant 0 : index
    %c0_2 = arith.constant 0 : index
    %1 = vector.load %arg2[%c0_1, %c0_2] : memref<1x32xf32, #tpu.memory_space<vmem>>, vector<1x32xf32>
    %c0_3 = arith.constant 0 : index
    %c0_4 = arith.constant 0 : index
    %2 = vector.load %arg3[%c0_3, %c0_4] : memref<1x32xf32, #tpu.memory_space<vmem>>, vector<1x32xf32>
    %cst = arith.constant dense<0.000000e+00> : vector<16xf32>
    %3 = vector.multi_reduction <add>, %0, %cst [1] : vector<16x32xf32> to vector<16xf32>
    %4 = vector.shape_cast %3 : vector<16xf32> to vector<16x1xf32>
    %cst_5 = arith.constant 3.200000e+01 : f32
    %5 = vector.broadcast %cst_5 : f32 to vector<16x1xf32>
    %6 = arith.divf %4, %5 : vector<16x1xf32>
    %7 = vector.broadcast %6 : vector<16x1xf32> to vector<16x32xf32>
    %8 = arith.subf %0, %7 : vector<16x32xf32>
    %9 = arith.mulf %8, %8 : vector<16x32xf32>
    %cst_6 = arith.constant dense<0.000000e+00> : vector<16xf32>
    %10 = vector.multi_reduction <add>, %9, %cst_6 [1] : vector<16x32xf32> to vector<16xf32>
    %11 = vector.shape_cast %10 : vector<16xf32> to vector<16x1xf32>
    %cst_7 = arith.constant 3.200000e+01 : f32
    %12 = vector.broadcast %cst_7 : f32 to vector<16x1xf32>
    %13 = arith.divf %11, %12 : vector<16x1xf32>
    %14 = vector.broadcast %6 : vector<16x1xf32> to vector<16x32xf32>
    %15 = arith.subf %0, %14 : vector<16x32xf32>
    %cst_8 = arith.constant 9.99999974E-6 : f32
    %16 = vector.broadcast %cst_8 : f32 to vector<16x1xf32>
    %17 = arith.addf %13, %16 : vector<16x1xf32>
    %18 = math.rsqrt %17 : vector<16x1xf32>
    %19 = vector.broadcast %18 : vector<16x1xf32> to vector<16x32xf32>
    %20 = arith.mulf %15, %19 : vector<16x32xf32>
    %21 = vector.broadcast %1 : vector<1x32xf32> to vector<16x32xf32>
    %22 = arith.mulf %20, %21 : vector<16x32xf32>
    %23 = vector.broadcast %2 : vector<1x32xf32> to vector<16x32xf32>
    %24 = arith.addf %22, %23 : vector<16x32xf32>
    %c0_9 = arith.constant 0 : index
    %c0_10 = arith.constant 0 : index
    %c0_11 = arith.constant 0 : index
    %25 = vector.load %arg1[%c0_9, %c0_10, %c0_11] : memref<1x16x16xf32, #tpu.memory_space<vmem>>, vector<1x16x16xf32>
    %c0_12 = arith.constant 0 : index
    %c0_13 = arith.constant 0 : index
    %c0_14 = arith.constant 0 : index
    %26 = vector.load %arg4[%c0_12, %c0_13, %c0_14] : memref<2x32x96xf32, #tpu.memory_space<vmem>>, vector<1x32x96xf32>
    %27 = vector.shape_cast %26 : vector<1x32x96xf32> to vector<32x96xf32>
    %cst_15 = arith.constant dense<0.000000e+00> : vector<16x96xf32>
    %28 = tpu.matmul %24, %27, %cst_15 {dimension_numbers = #tpu.dot_dimension_numbers<[1], [0], [0], [1], [0, 0, 1, 1], [], []>} : vector<16x32xf32>, vector<32x96xf32>, vector<16x96xf32> -> vector<16x96xf32>
    %c0_16 = arith.constant 0 : index
    %c0_17 = arith.constant 0 : index
    %c0_18 = arith.constant 0 : index
    %29 = vector.load %arg5[%c0_16, %c0_17, %c0_18] : memref<2x1x96xf32, #tpu.memory_space<vmem>>, vector<1x1x96xf32>
    %30 = vector.shape_cast %29 : vector<1x1x96xf32> to vector<1x96xf32>
    %31 = vector.broadcast %30 : vector<1x96xf32> to vector<16x96xf32>
    %32 = arith.addf %28, %31 : vector<16x96xf32>
    %33 = vector.extract_strided_slice %32 {offsets = [0, 0], sizes = [16, 32], strides = [1, 1]} : vector<16x96xf32> to vector<16x32xf32>
    %34 = vector.extract_strided_slice %33 {offsets = [0, 0], sizes = [16, 8], strides = [1, 1]} : vector<16x32xf32> to vector<16x8xf32>
    %35 = vector.extract_strided_slice %33 {offsets = [0, 8], sizes = [16, 8], strides = [1, 1]} : vector<16x32xf32> to vector<16x8xf32>
    %36 = vector.extract_strided_slice %33 {offsets = [0, 16], sizes = [16, 8], strides = [1, 1]} : vector<16x32xf32> to vector<16x8xf32>
    %37 = vector.extract_strided_slice %33 {offsets = [0, 24], sizes = [16, 8], strides = [1, 1]} : vector<16x32xf32> to vector<16x8xf32>
    %38 = vector.shape_cast %34 : vector<16x8xf32> to vector<1x16x8xf32>
    %39 = vector.shape_cast %35 : vector<16x8xf32> to vector<1x16x8xf32>
    %40 = vector.shape_cast %36 : vector<16x8xf32> to vector<1x16x8xf32>
    %41 = vector.shape_cast %37 : vector<16x8xf32> to vector<1x16x8xf32>
    %42 = tpu.concatenate %38, %39, %40, %41 in 0 : vector<1x16x8xf32>, vector<1x16x8xf32>, vector<1x16x8xf32>, vector<1x16x8xf32> -> vector<4x16x8xf32>
    %43 = vector.extract_strided_slice %32 {offsets = [0, 32], sizes = [16, 32], strides = [1, 1]} : vector<16x96xf32> to vector<16x32xf32>
    %44 = vector.extract_strided_slice %43 {offsets = [0, 0], sizes = [16, 8], strides = [1, 1]} : vector<16x32xf32> to vector<16x8xf32>
    %45 = vector.extract_strided_slice %43 {offsets = [0, 8], sizes = [16, 8], strides = [1, 1]} : vector<16x32xf32> to vector<16x8xf32>
    %46 = vector.extract_strided_slice %43 {offsets = [0, 16], sizes = [16, 8], strides = [1, 1]} : vector<16x32xf32> to vector<16x8xf32>
    %47 = vector.extract_strided_slice %43 {offsets = [0, 24], sizes = [16, 8], strides = [1, 1]} : vector<16x32xf32> to vector<16x8xf32>
    %48 = vector.shape_cast %44 : vector<16x8xf32> to vector<1x16x8xf32>
    %49 = vector.shape_cast %45 : vector<16x8xf32> to vector<1x16x8xf32>
    %50 = vector.shape_cast %46 : vector<16x8xf32> to vector<1x16x8xf32>
    %51 = vector.shape_cast %47 : vector<16x8xf32> to vector<1x16x8xf32>
    %52 = tpu.concatenate %48, %49, %50, %51 in 0 : vector<1x16x8xf32>, vector<1x16x8xf32>, vector<1x16x8xf32>, vector<1x16x8xf32> -> vector<4x16x8xf32>
    %53 = vector.extract_strided_slice %32 {offsets = [0, 64], sizes = [16, 32], strides = [1, 1]} : vector<16x96xf32> to vector<16x32xf32>
    %54 = vector.extract_strided_slice %53 {offsets = [0, 0], sizes = [16, 8], strides = [1, 1]} : vector<16x32xf32> to vector<16x8xf32>
    %55 = vector.extract_strided_slice %53 {offsets = [0, 8], sizes = [16, 8], strides = [1, 1]} : vector<16x32xf32> to vector<16x8xf32>
    %56 = vector.extract_strided_slice %53 {offsets = [0, 16], sizes = [16, 8], strides = [1, 1]} : vector<16x32xf32> to vector<16x8xf32>
    %57 = vector.extract_strided_slice %53 {offsets = [0, 24], sizes = [16, 8], strides = [1, 1]} : vector<16x32xf32> to vector<16x8xf32>
    %58 = vector.shape_cast %54 : vector<16x8xf32> to vector<1x16x8xf32>
    %59 = vector.shape_cast %55 : vector<16x8xf32> to vector<1x16x8xf32>
    %60 = vector.shape_cast %56 : vector<16x8xf32> to vector<1x16x8xf32>
    %61 = vector.shape_cast %57 : vector<16x8xf32> to vector<1x16x8xf32>
    %62 = tpu.concatenate %58, %59, %60, %61 in 0 : vector<1x16x8xf32>, vector<1x16x8xf32>, vector<1x16x8xf32>, vector<1x16x8xf32> -> vector<4x16x8xf32>
    "tpu.trace_start"() <{level = 10 : i32, message = "hqd,hkd->hqk"}> : () -> ()
    %cst_19 = arith.constant dense<0.000000e+00> : vector<4x16x16xf32>
    %63 = tpu.matmul %42, %52, %cst_19 {dimension_numbers = #tpu.dot_dimension_numbers<[2], [2], [1], [1], [0, 0, 0, 1, 1, 1], [0], [0]>} : vector<4x16x8xf32>, vector<4x16x8xf32>, vector<4x16x16xf32> -> vector<4x16x16xf32>
    "tpu.trace_stop"() : () -> ()
    %cst_20 = arith.constant 0.353553385 : f32
    %64 = vector.broadcast %cst_20 : f32 to vector<4x16x16xf32>
    %65 = arith.mulf %63, %64 : vector<4x16x16xf32>
    %66 = vector.broadcast %25 : vector<1x16x16xf32> to vector<4x16x16xf32>
    %67 = arith.addf %65, %66 : vector<4x16x16xf32>
    %cst_21 = arith.constant dense<0xFF800000> : vector<4x16xf32>
    %68 = vector.multi_reduction <maximumf>, %67, %cst_21 [2] : vector<4x16x16xf32> to vector<4x16xf32>
    %69 = vector.shape_cast %68 : vector<4x16xf32> to vector<4x16x1xf32>
    %70 = vector.broadcast %69 : vector<4x16x1xf32> to vector<4x16x16xf32>
    %71 = arith.subf %67, %70 : vector<4x16x16xf32>
    %72 = math.exp %71 : vector<4x16x16xf32>
    %cst_22 = arith.constant dense<0.000000e+00> : vector<4x16xf32>
    %73 = vector.multi_reduction <add>, %72, %cst_22 [2] : vector<4x16x16xf32> to vector<4x16xf32>
    %74 = vector.shape_cast %73 : vector<4x16xf32> to vector<4x16x1xf32>
    %75 = tpu.reciprocal %74 {approx = true} : vector<4x16x1xf32> -> vector<4x16x1xf32>
    %76 = vector.broadcast %75 : vector<4x16x1xf32> to vector<4x16x16xf32>
    %77 = arith.mulf %72, %76 : vector<4x16x16xf32>
    "tpu.trace_start"() <{level = 10 : i32, message = "hqk,hkd->hqd"}> : () -> ()
    %cst_23 = arith.constant dense<0.000000e+00> : vector<4x16x8xf32>
    %78 = tpu.matmul %77, %62, %cst_23 {dimension_numbers = #tpu.dot_dimension_numbers<[2], [1], [1], [2], [0, 0, 0, 1, 1, 2], [0], [0]>} : vector<4x16x16xf32>, vector<4x16x8xf32>, vector<4x16x8xf32> -> vector<4x16x8xf32>
    "tpu.trace_stop"() : () -> ()
    %79 = vector.extract_strided_slice %78 {offsets = [0, 0, 0], sizes = [1, 16, 8], strides = [1, 1, 1]} : vector<4x16x8xf32> to vector<1x16x8xf32>
    %80 = vector.shape_cast %79 : vector<1x16x8xf32> to vector<16x8xf32>
    %81 = vector.extract_strided_slice %78 {offsets = [1, 0, 0], sizes = [1, 16, 8], strides = [1, 1, 1]} : vector<4x16x8xf32> to vector<1x16x8xf32>
    %82 = vector.shape_cast %81 : vector<1x16x8xf32> to vector<16x8xf32>
    %83 = vector.extract_strided_slice %78 {offsets = [2, 0, 0], sizes = [1, 16, 8], strides = [1, 1, 1]} : vector<4x16x8xf32> to vector<1x16x8xf32>
    %84 = vector.shape_cast %83 : vector<1x16x8xf32> to vector<16x8xf32>
    %85 = vector.extract_strided_slice %78 {offsets = [3, 0, 0], sizes = [1, 16, 8], strides = [1, 1, 1]} : vector<4x16x8xf32> to vector<1x16x8xf32>
    %86 = vector.shape_cast %85 : vector<1x16x8xf32> to vector<16x8xf32>
    %87 = tpu.concatenate %80, %82, %84, %86 in 1 : vector<16x8xf32>, vector<16x8xf32>, vector<16x8xf32>, vector<16x8xf32> -> vector<16x32xf32>
    %c0_24 = arith.constant 0 : index
    %c0_25 = arith.constant 0 : index
    %c0_26 = arith.constant 0 : index
    %88 = vector.load %arg6[%c0_24, %c0_25, %c0_26] : memref<2x32x32xf32, #tpu.memory_space<vmem>>, vector<1x32x32xf32>
    %89 = vector.shape_cast %88 : vector<1x32x32xf32> to vector<32x32xf32>
    %cst_27 = arith.constant dense<0.000000e+00> : vector<16x32xf32>
    %90 = tpu.matmul %87, %89, %cst_27 {dimension_numbers = #tpu.dot_dimension_numbers<[1], [0], [0], [1], [0, 0, 1, 1], [], []>} : vector<16x32xf32>, vector<32x32xf32>, vector<16x32xf32> -> vector<16x32xf32>
    %c0_28 = arith.constant 0 : index
    %c0_29 = arith.constant 0 : index
    %c0_30 = arith.constant 0 : index
    %91 = vector.load %arg7[%c0_28, %c0_29, %c0_30] : memref<2x1x32xf32, #tpu.memory_space<vmem>>, vector<1x1x32xf32>
    %92 = vector.shape_cast %91 : vector<1x1x32xf32> to vector<1x32xf32>
    %93 = vector.broadcast %92 : vector<1x32xf32> to vector<16x32xf32>
    %94 = arith.addf %90, %93 : vector<16x32xf32>
    %95 = arith.addf %94, %24 : vector<16x32xf32>
    %c0_31 = arith.constant 0 : index
    %c0_32 = arith.constant 0 : index
    %c0_33 = arith.constant 0 : index
    %96 = vector.load %arg8[%c0_31, %c0_32, %c0_33] : memref<2x1x32xf32, #tpu.memory_space<vmem>>, vector<1x1x32xf32>
    %97 = vector.shape_cast %96 : vector<1x1x32xf32> to vector<1x32xf32>
    %c0_34 = arith.constant 0 : index
    %c0_35 = arith.constant 0 : index
    %c0_36 = arith.constant 0 : index
    %98 = vector.load %arg9[%c0_34, %c0_35, %c0_36] : memref<2x1x32xf32, #tpu.memory_space<vmem>>, vector<1x1x32xf32>
    %99 = vector.shape_cast %98 : vector<1x1x32xf32> to vector<1x32xf32>
    %cst_37 = arith.constant dense<0.000000e+00> : vector<16xf32>
    %100 = vector.multi_reduction <add>, %95, %cst_37 [1] : vector<16x32xf32> to vector<16xf32>
    %101 = vector.shape_cast %100 : vector<16xf32> to vector<16x1xf32>
    %cst_38 = arith.constant 3.200000e+01 : f32
    %102 = vector.broadcast %cst_38 : f32 to vector<16x1xf32>
    %103 = arith.divf %101, %102 : vector<16x1xf32>
    %104 = vector.broadcast %103 : vector<16x1xf32> to vector<16x32xf32>
    %105 = arith.subf %95, %104 : vector<16x32xf32>
    %106 = arith.mulf %105, %105 : vector<16x32xf32>
    %cst_39 = arith.constant dense<0.000000e+00> : vector<16xf32>
    %107 = vector.multi_reduction <add>, %106, %cst_39 [1] : vector<16x32xf32> to vector<16xf32>
    %108 = vector.shape_cast %107 : vector<16xf32> to vector<16x1xf32>
    %cst_40 = arith.constant 3.200000e+01 : f32
    %109 = vector.broadcast %cst_40 : f32 to vector<16x1xf32>
    %110 = arith.divf %108, %109 : vector<16x1xf32>
    %111 = vector.broadcast %103 : vector<16x1xf32> to vector<16x32xf32>
    %112 = arith.subf %95, %111 : vector<16x32xf32>
    %cst_41 = arith.constant 9.99999974E-6 : f32
    %113 = vector.broadcast %cst_41 : f32 to vector<16x1xf32>
    %114 = arith.addf %110, %113 : vector<16x1xf32>
    %115 = math.rsqrt %114 : vector<16x1xf32>
    %116 = vector.broadcast %115 : vector<16x1xf32> to vector<16x32xf32>
    %117 = arith.mulf %112, %116 : vector<16x32xf32>
    %118 = vector.broadcast %97 : vector<1x32xf32> to vector<16x32xf32>
    %119 = arith.mulf %117, %118 : vector<16x32xf32>
    %120 = vector.broadcast %99 : vector<1x32xf32> to vector<16x32xf32>
    %121 = arith.addf %119, %120 : vector<16x32xf32>
    %c0_42 = arith.constant 0 : index
    %c0_43 = arith.constant 0 : index
    %c0_44 = arith.constant 0 : index
    %122 = vector.load %arg10[%c0_42, %c0_43, %c0_44] : memref<2x32x64xf32, #tpu.memory_space<vmem>>, vector<1x32x64xf32>
    %123 = vector.shape_cast %122 : vector<1x32x64xf32> to vector<32x64xf32>
    %cst_45 = arith.constant dense<0.000000e+00> : vector<16x64xf32>
    %124 = tpu.matmul %121, %123, %cst_45 {dimension_numbers = #tpu.dot_dimension_numbers<[1], [0], [0], [1], [0, 0, 1, 1], [], []>} : vector<16x32xf32>, vector<32x64xf32>, vector<16x64xf32> -> vector<16x64xf32>
    %c0_46 = arith.constant 0 : index
    %c0_47 = arith.constant 0 : index
    %c0_48 = arith.constant 0 : index
    %125 = vector.load %arg11[%c0_46, %c0_47, %c0_48] : memref<2x1x64xf32, #tpu.memory_space<vmem>>, vector<1x1x64xf32>
    %126 = vector.shape_cast %125 : vector<1x1x64xf32> to vector<1x64xf32>
    %127 = vector.broadcast %126 : vector<1x64xf32> to vector<16x64xf32>
    %128 = arith.addf %124, %127 : vector<16x64xf32>
    %cst_49 = arith.constant 5.000000e-01 : f32
    %129 = vector.broadcast %cst_49 : f32 to vector<16x64xf32>
    %130 = arith.mulf %129, %128 : vector<16x64xf32>
    %cst_50 = arith.constant 4.471500e-02 : f32
    %131 = vector.broadcast %cst_50 : f32 to vector<16x64xf32>
    %132 = arith.mulf %131, %128 : vector<16x64xf32>
    %133 = arith.mulf %132, %128 : vector<16x64xf32>
    %134 = arith.mulf %133, %128 : vector<16x64xf32>
    %135 = arith.addf %128, %134 : vector<16x64xf32>
    %cst_51 = arith.constant 0.797884583 : f32
    %136 = vector.broadcast %cst_51 : f32 to vector<16x64xf32>
    %137 = arith.mulf %136, %135 : vector<16x64xf32>
    %138 = math.tanh %137 : vector<16x64xf32>
    %cst_52 = arith.constant 1.000000e+00 : f32
    %139 = vector.broadcast %cst_52 : f32 to vector<16x64xf32>
    %140 = arith.addf %139, %138 : vector<16x64xf32>
    %141 = arith.mulf %130, %140 : vector<16x64xf32>
    %c0_53 = arith.constant 0 : index
    %c0_54 = arith.constant 0 : index
    %c0_55 = arith.constant 0 : index
    %142 = vector.load %arg12[%c0_53, %c0_54, %c0_55] : memref<2x64x32xf32, #tpu.memory_space<vmem>>, vector<1x64x32xf32>
    %143 = vector.shape_cast %142 : vector<1x64x32xf32> to vector<64x32xf32>
    %cst_56 = arith.constant dense<0.000000e+00> : vector<16x32xf32>
    %144 = tpu.matmul %141, %143, %cst_56 {dimension_numbers = #tpu.dot_dimension_numbers<[1], [0], [0], [1], [0, 0, 1, 1], [], []>} : vector<16x64xf32>, vector<64x32xf32>, vector<16x32xf32> -> vector<16x32xf32>
    %c0_57 = arith.constant 0 : index
    %c0_58 = arith.constant 0 : index
    %c0_59 = arith.constant 0 : index
    %145 = vector.load %arg13[%c0_57, %c0_58, %c0_59] : memref<2x1x32xf32, #tpu.memory_space<vmem>>, vector<1x1x32xf32>
    %146 = vector.shape_cast %145 : vector<1x1x32xf32> to vector<1x32xf32>
    %147 = vector.broadcast %146 : vector<1x32xf32> to vector<16x32xf32>
    %148 = arith.addf %144, %147 : vector<16x32xf32>
    %149 = arith.addf %148, %121 : vector<16x32xf32>
    %c0_60 = arith.constant 0 : index
    %c0_61 = arith.constant 0 : index
    %c0_62 = arith.constant 0 : index
    %150 = vector.load %arg14[%c0_60, %c0_61, %c0_62] : memref<2x1x32xf32, #tpu.memory_space<vmem>>, vector<1x1x32xf32>
    %151 = vector.shape_cast %150 : vector<1x1x32xf32> to vector<1x32xf32>
    %c0_63 = arith.constant 0 : index
    %c0_64 = arith.constant 0 : index
    %c0_65 = arith.constant 0 : index
    %152 = vector.load %arg15[%c0_63, %c0_64, %c0_65] : memref<2x1x32xf32, #tpu.memory_space<vmem>>, vector<1x1x32xf32>
    %153 = vector.shape_cast %152 : vector<1x1x32xf32> to vector<1x32xf32>
    %cst_66 = arith.constant dense<0.000000e+00> : vector<16xf32>
    %154 = vector.multi_reduction <add>, %149, %cst_66 [1] : vector<16x32xf32> to vector<16xf32>
    %155 = vector.shape_cast %154 : vector<16xf32> to vector<16x1xf32>
    %cst_67 = arith.constant 3.200000e+01 : f32
    %156 = vector.broadcast %cst_67 : f32 to vector<16x1xf32>
    %157 = arith.divf %155, %156 : vector<16x1xf32>
    %158 = vector.broadcast %157 : vector<16x1xf32> to vector<16x32xf32>
    %159 = arith.subf %149, %158 : vector<16x32xf32>
    %160 = arith.mulf %159, %159 : vector<16x32xf32>
    %cst_68 = arith.constant dense<0.000000e+00> : vector<16xf32>
    %161 = vector.multi_reduction <add>, %160, %cst_68 [1] : vector<16x32xf32> to vector<16xf32>
    %162 = vector.shape_cast %161 : vector<16xf32> to vector<16x1xf32>
    %cst_69 = arith.constant 3.200000e+01 : f32
    %163 = vector.broadcast %cst_69 : f32 to vector<16x1xf32>
    %164 = arith.divf %162, %163 : vector<16x1xf32>
    %165 = vector.broadcast %157 : vector<16x1xf32> to vector<16x32xf32>
    %166 = arith.subf %149, %165 : vector<16x32xf32>
    %cst_70 = arith.constant 9.99999974E-6 : f32
    %167 = vector.broadcast %cst_70 : f32 to vector<16x1xf32>
    %168 = arith.addf %164, %167 : vector<16x1xf32>
    %169 = math.rsqrt %168 : vector<16x1xf32>
    %170 = vector.broadcast %169 : vector<16x1xf32> to vector<16x32xf32>
    %171 = arith.mulf %166, %170 : vector<16x32xf32>
    %172 = vector.broadcast %151 : vector<1x32xf32> to vector<16x32xf32>
    %173 = arith.mulf %171, %172 : vector<16x32xf32>
    %174 = vector.broadcast %153 : vector<1x32xf32> to vector<16x32xf32>
    %175 = arith.addf %173, %174 : vector<16x32xf32>
    %c1 = arith.constant 1 : index
    %c0_71 = arith.constant 0 : index
    %c0_72 = arith.constant 0 : index
    %176 = vector.load %arg4[%c1, %c0_71, %c0_72] : memref<2x32x96xf32, #tpu.memory_space<vmem>>, vector<1x32x96xf32>
    %177 = vector.shape_cast %176 : vector<1x32x96xf32> to vector<32x96xf32>
    %cst_73 = arith.constant dense<0.000000e+00> : vector<16x96xf32>
    %178 = tpu.matmul %175, %177, %cst_73 {dimension_numbers = #tpu.dot_dimension_numbers<[1], [0], [0], [1], [0, 0, 1, 1], [], []>} : vector<16x32xf32>, vector<32x96xf32>, vector<16x96xf32> -> vector<16x96xf32>
    %c1_74 = arith.constant 1 : index
    %c0_75 = arith.constant 0 : index
    %c0_76 = arith.constant 0 : index
    %179 = vector.load %arg5[%c1_74, %c0_75, %c0_76] : memref<2x1x96xf32, #tpu.memory_space<vmem>>, vector<1x1x96xf32>
    %180 = vector.shape_cast %179 : vector<1x1x96xf32> to vector<1x96xf32>
    %181 = vector.broadcast %180 : vector<1x96xf32> to vector<16x96xf32>
    %182 = arith.addf %178, %181 : vector<16x96xf32>
    %183 = vector.extract_strided_slice %182 {offsets = [0, 0], sizes = [16, 32], strides = [1, 1]} : vector<16x96xf32> to vector<16x32xf32>
    %184 = vector.extract_strided_slice %183 {offsets = [0, 0], sizes = [16, 8], strides = [1, 1]} : vector<16x32xf32> to vector<16x8xf32>
    %185 = vector.extract_strided_slice %183 {offsets = [0, 8], sizes = [16, 8], strides = [1, 1]} : vector<16x32xf32> to vector<16x8xf32>
    %186 = vector.extract_strided_slice %183 {offsets = [0, 16], sizes = [16, 8], strides = [1, 1]} : vector<16x32xf32> to vector<16x8xf32>
    %187 = vector.extract_strided_slice %183 {offsets = [0, 24], sizes = [16, 8], strides = [1, 1]} : vector<16x32xf32> to vector<16x8xf32>
    %188 = vector.shape_cast %184 : vector<16x8xf32> to vector<1x16x8xf32>
    %189 = vector.shape_cast %185 : vector<16x8xf32> to vector<1x16x8xf32>
    %190 = vector.shape_cast %186 : vector<16x8xf32> to vector<1x16x8xf32>
    %191 = vector.shape_cast %187 : vector<16x8xf32> to vector<1x16x8xf32>
    %192 = tpu.concatenate %188, %189, %190, %191 in 0 : vector<1x16x8xf32>, vector<1x16x8xf32>, vector<1x16x8xf32>, vector<1x16x8xf32> -> vector<4x16x8xf32>
    %193 = vector.extract_strided_slice %182 {offsets = [0, 32], sizes = [16, 32], strides = [1, 1]} : vector<16x96xf32> to vector<16x32xf32>
    %194 = vector.extract_strided_slice %193 {offsets = [0, 0], sizes = [16, 8], strides = [1, 1]} : vector<16x32xf32> to vector<16x8xf32>
    %195 = vector.extract_strided_slice %193 {offsets = [0, 8], sizes = [16, 8], strides = [1, 1]} : vector<16x32xf32> to vector<16x8xf32>
    %196 = vector.extract_strided_slice %193 {offsets = [0, 16], sizes = [16, 8], strides = [1, 1]} : vector<16x32xf32> to vector<16x8xf32>
    %197 = vector.extract_strided_slice %193 {offsets = [0, 24], sizes = [16, 8], strides = [1, 1]} : vector<16x32xf32> to vector<16x8xf32>
    %198 = vector.shape_cast %194 : vector<16x8xf32> to vector<1x16x8xf32>
    %199 = vector.shape_cast %195 : vector<16x8xf32> to vector<1x16x8xf32>
    %200 = vector.shape_cast %196 : vector<16x8xf32> to vector<1x16x8xf32>
    %201 = vector.shape_cast %197 : vector<16x8xf32> to vector<1x16x8xf32>
    %202 = tpu.concatenate %198, %199, %200, %201 in 0 : vector<1x16x8xf32>, vector<1x16x8xf32>, vector<1x16x8xf32>, vector<1x16x8xf32> -> vector<4x16x8xf32>
    %203 = vector.extract_strided_slice %182 {offsets = [0, 64], sizes = [16, 32], strides = [1, 1]} : vector<16x96xf32> to vector<16x32xf32>
    %204 = vector.extract_strided_slice %203 {offsets = [0, 0], sizes = [16, 8], strides = [1, 1]} : vector<16x32xf32> to vector<16x8xf32>
    %205 = vector.extract_strided_slice %203 {offsets = [0, 8], sizes = [16, 8], strides = [1, 1]} : vector<16x32xf32> to vector<16x8xf32>
    %206 = vector.extract_strided_slice %203 {offsets = [0, 16], sizes = [16, 8], strides = [1, 1]} : vector<16x32xf32> to vector<16x8xf32>
    %207 = vector.extract_strided_slice %203 {offsets = [0, 24], sizes = [16, 8], strides = [1, 1]} : vector<16x32xf32> to vector<16x8xf32>
    %208 = vector.shape_cast %204 : vector<16x8xf32> to vector<1x16x8xf32>
    %209 = vector.shape_cast %205 : vector<16x8xf32> to vector<1x16x8xf32>
    %210 = vector.shape_cast %206 : vector<16x8xf32> to vector<1x16x8xf32>
    %211 = vector.shape_cast %207 : vector<16x8xf32> to vector<1x16x8xf32>
    %212 = tpu.concatenate %208, %209, %210, %211 in 0 : vector<1x16x8xf32>, vector<1x16x8xf32>, vector<1x16x8xf32>, vector<1x16x8xf32> -> vector<4x16x8xf32>
    "tpu.trace_start"() <{level = 10 : i32, message = "hqd,hkd->hqk"}> : () -> ()
    %cst_77 = arith.constant dense<0.000000e+00> : vector<4x16x16xf32>
    %213 = tpu.matmul %192, %202, %cst_77 {dimension_numbers = #tpu.dot_dimension_numbers<[2], [2], [1], [1], [0, 0, 0, 1, 1, 1], [0], [0]>} : vector<4x16x8xf32>, vector<4x16x8xf32>, vector<4x16x16xf32> -> vector<4x16x16xf32>
    "tpu.trace_stop"() : () -> ()
    %cst_78 = arith.constant 0.353553385 : f32
    %214 = vector.broadcast %cst_78 : f32 to vector<4x16x16xf32>
    %215 = arith.mulf %213, %214 : vector<4x16x16xf32>
    %216 = vector.broadcast %25 : vector<1x16x16xf32> to vector<4x16x16xf32>
    %217 = arith.addf %215, %216 : vector<4x16x16xf32>
    %cst_79 = arith.constant dense<0xFF800000> : vector<4x16xf32>
    %218 = vector.multi_reduction <maximumf>, %217, %cst_79 [2] : vector<4x16x16xf32> to vector<4x16xf32>
    %219 = vector.shape_cast %218 : vector<4x16xf32> to vector<4x16x1xf32>
    %220 = vector.broadcast %219 : vector<4x16x1xf32> to vector<4x16x16xf32>
    %221 = arith.subf %217, %220 : vector<4x16x16xf32>
    %222 = math.exp %221 : vector<4x16x16xf32>
    %cst_80 = arith.constant dense<0.000000e+00> : vector<4x16xf32>
    %223 = vector.multi_reduction <add>, %222, %cst_80 [2] : vector<4x16x16xf32> to vector<4x16xf32>
    %224 = vector.shape_cast %223 : vector<4x16xf32> to vector<4x16x1xf32>
    %225 = tpu.reciprocal %224 {approx = true} : vector<4x16x1xf32> -> vector<4x16x1xf32>
    %226 = vector.broadcast %225 : vector<4x16x1xf32> to vector<4x16x16xf32>
    %227 = arith.mulf %222, %226 : vector<4x16x16xf32>
    "tpu.trace_start"() <{level = 10 : i32, message = "hqk,hkd->hqd"}> : () -> ()
    %cst_81 = arith.constant dense<0.000000e+00> : vector<4x16x8xf32>
    %228 = tpu.matmul %227, %212, %cst_81 {dimension_numbers = #tpu.dot_dimension_numbers<[2], [1], [1], [2], [0, 0, 0, 1, 1, 2], [0], [0]>} : vector<4x16x16xf32>, vector<4x16x8xf32>, vector<4x16x8xf32> -> vector<4x16x8xf32>
    "tpu.trace_stop"() : () -> ()
    %229 = vector.extract_strided_slice %228 {offsets = [0, 0, 0], sizes = [1, 16, 8], strides = [1, 1, 1]} : vector<4x16x8xf32> to vector<1x16x8xf32>
    %230 = vector.shape_cast %229 : vector<1x16x8xf32> to vector<16x8xf32>
    %231 = vector.extract_strided_slice %228 {offsets = [1, 0, 0], sizes = [1, 16, 8], strides = [1, 1, 1]} : vector<4x16x8xf32> to vector<1x16x8xf32>
    %232 = vector.shape_cast %231 : vector<1x16x8xf32> to vector<16x8xf32>
    %233 = vector.extract_strided_slice %228 {offsets = [2, 0, 0], sizes = [1, 16, 8], strides = [1, 1, 1]} : vector<4x16x8xf32> to vector<1x16x8xf32>
    %234 = vector.shape_cast %233 : vector<1x16x8xf32> to vector<16x8xf32>
    %235 = vector.extract_strided_slice %228 {offsets = [3, 0, 0], sizes = [1, 16, 8], strides = [1, 1, 1]} : vector<4x16x8xf32> to vector<1x16x8xf32>
    %236 = vector.shape_cast %235 : vector<1x16x8xf32> to vector<16x8xf32>
    %237 = tpu.concatenate %230, %232, %234, %236 in 1 : vector<16x8xf32>, vector<16x8xf32>, vector<16x8xf32>, vector<16x8xf32> -> vector<16x32xf32>
    %c1_82 = arith.constant 1 : index
    %c0_83 = arith.constant 0 : index
    %c0_84 = arith.constant 0 : index
    %238 = vector.load %arg6[%c1_82, %c0_83, %c0_84] : memref<2x32x32xf32, #tpu.memory_space<vmem>>, vector<1x32x32xf32>
    %239 = vector.shape_cast %238 : vector<1x32x32xf32> to vector<32x32xf32>
    %cst_85 = arith.constant dense<0.000000e+00> : vector<16x32xf32>
    %240 = tpu.matmul %237, %239, %cst_85 {dimension_numbers = #tpu.dot_dimension_numbers<[1], [0], [0], [1], [0, 0, 1, 1], [], []>} : vector<16x32xf32>, vector<32x32xf32>, vector<16x32xf32> -> vector<16x32xf32>
    %c1_86 = arith.constant 1 : index
    %c0_87 = arith.constant 0 : index
    %c0_88 = arith.constant 0 : index
    %241 = vector.load %arg7[%c1_86, %c0_87, %c0_88] : memref<2x1x32xf32, #tpu.memory_space<vmem>>, vector<1x1x32xf32>
    %242 = vector.shape_cast %241 : vector<1x1x32xf32> to vector<1x32xf32>
    %243 = vector.broadcast %242 : vector<1x32xf32> to vector<16x32xf32>
    %244 = arith.addf %240, %243 : vector<16x32xf32>
    %245 = arith.addf %244, %175 : vector<16x32xf32>
    %c1_89 = arith.constant 1 : index
    %c0_90 = arith.constant 0 : index
    %c0_91 = arith.constant 0 : index
    %246 = vector.load %arg8[%c1_89, %c0_90, %c0_91] : memref<2x1x32xf32, #tpu.memory_space<vmem>>, vector<1x1x32xf32>
    %247 = vector.shape_cast %246 : vector<1x1x32xf32> to vector<1x32xf32>
    %c1_92 = arith.constant 1 : index
    %c0_93 = arith.constant 0 : index
    %c0_94 = arith.constant 0 : index
    %248 = vector.load %arg9[%c1_92, %c0_93, %c0_94] : memref<2x1x32xf32, #tpu.memory_space<vmem>>, vector<1x1x32xf32>
    %249 = vector.shape_cast %248 : vector<1x1x32xf32> to vector<1x32xf32>
    %cst_95 = arith.constant dense<0.000000e+00> : vector<16xf32>
    %250 = vector.multi_reduction <add>, %245, %cst_95 [1] : vector<16x32xf32> to vector<16xf32>
    %251 = vector.shape_cast %250 : vector<16xf32> to vector<16x1xf32>
    %cst_96 = arith.constant 3.200000e+01 : f32
    %252 = vector.broadcast %cst_96 : f32 to vector<16x1xf32>
    %253 = arith.divf %251, %252 : vector<16x1xf32>
    %254 = vector.broadcast %253 : vector<16x1xf32> to vector<16x32xf32>
    %255 = arith.subf %245, %254 : vector<16x32xf32>
    %256 = arith.mulf %255, %255 : vector<16x32xf32>
    %cst_97 = arith.constant dense<0.000000e+00> : vector<16xf32>
    %257 = vector.multi_reduction <add>, %256, %cst_97 [1] : vector<16x32xf32> to vector<16xf32>
    %258 = vector.shape_cast %257 : vector<16xf32> to vector<16x1xf32>
    %cst_98 = arith.constant 3.200000e+01 : f32
    %259 = vector.broadcast %cst_98 : f32 to vector<16x1xf32>
    %260 = arith.divf %258, %259 : vector<16x1xf32>
    %261 = vector.broadcast %253 : vector<16x1xf32> to vector<16x32xf32>
    %262 = arith.subf %245, %261 : vector<16x32xf32>
    %cst_99 = arith.constant 9.99999974E-6 : f32
    %263 = vector.broadcast %cst_99 : f32 to vector<16x1xf32>
    %264 = arith.addf %260, %263 : vector<16x1xf32>
    %265 = math.rsqrt %264 : vector<16x1xf32>
    %266 = vector.broadcast %265 : vector<16x1xf32> to vector<16x32xf32>
    %267 = arith.mulf %262, %266 : vector<16x32xf32>
    %268 = vector.broadcast %247 : vector<1x32xf32> to vector<16x32xf32>
    %269 = arith.mulf %267, %268 : vector<16x32xf32>
    %270 = vector.broadcast %249 : vector<1x32xf32> to vector<16x32xf32>
    %271 = arith.addf %269, %270 : vector<16x32xf32>
    %c1_100 = arith.constant 1 : index
    %c0_101 = arith.constant 0 : index
    %c0_102 = arith.constant 0 : index
    %272 = vector.load %arg10[%c1_100, %c0_101, %c0_102] : memref<2x32x64xf32, #tpu.memory_space<vmem>>, vector<1x32x64xf32>
    %273 = vector.shape_cast %272 : vector<1x32x64xf32> to vector<32x64xf32>
    %cst_103 = arith.constant dense<0.000000e+00> : vector<16x64xf32>
    %274 = tpu.matmul %271, %273, %cst_103 {dimension_numbers = #tpu.dot_dimension_numbers<[1], [0], [0], [1], [0, 0, 1, 1], [], []>} : vector<16x32xf32>, vector<32x64xf32>, vector<16x64xf32> -> vector<16x64xf32>
    %c1_104 = arith.constant 1 : index
    %c0_105 = arith.constant 0 : index
    %c0_106 = arith.constant 0 : index
    %275 = vector.load %arg11[%c1_104, %c0_105, %c0_106] : memref<2x1x64xf32, #tpu.memory_space<vmem>>, vector<1x1x64xf32>
    %276 = vector.shape_cast %275 : vector<1x1x64xf32> to vector<1x64xf32>
    %277 = vector.broadcast %276 : vector<1x64xf32> to vector<16x64xf32>
    %278 = arith.addf %274, %277 : vector<16x64xf32>
    %cst_107 = arith.constant 5.000000e-01 : f32
    %279 = vector.broadcast %cst_107 : f32 to vector<16x64xf32>
    %280 = arith.mulf %279, %278 : vector<16x64xf32>
    %cst_108 = arith.constant 4.471500e-02 : f32
    %281 = vector.broadcast %cst_108 : f32 to vector<16x64xf32>
    %282 = arith.mulf %281, %278 : vector<16x64xf32>
    %283 = arith.mulf %282, %278 : vector<16x64xf32>
    %284 = arith.mulf %283, %278 : vector<16x64xf32>
    %285 = arith.addf %278, %284 : vector<16x64xf32>
    %cst_109 = arith.constant 0.797884583 : f32
    %286 = vector.broadcast %cst_109 : f32 to vector<16x64xf32>
    %287 = arith.mulf %286, %285 : vector<16x64xf32>
    %288 = math.tanh %287 : vector<16x64xf32>
    %cst_110 = arith.constant 1.000000e+00 : f32
    %289 = vector.broadcast %cst_110 : f32 to vector<16x64xf32>
    %290 = arith.addf %289, %288 : vector<16x64xf32>
    %291 = arith.mulf %280, %290 : vector<16x64xf32>
    %c1_111 = arith.constant 1 : index
    %c0_112 = arith.constant 0 : index
    %c0_113 = arith.constant 0 : index
    %292 = vector.load %arg12[%c1_111, %c0_112, %c0_113] : memref<2x64x32xf32, #tpu.memory_space<vmem>>, vector<1x64x32xf32>
    %293 = vector.shape_cast %292 : vector<1x64x32xf32> to vector<64x32xf32>
    %cst_114 = arith.constant dense<0.000000e+00> : vector<16x32xf32>
    %294 = tpu.matmul %291, %293, %cst_114 {dimension_numbers = #tpu.dot_dimension_numbers<[1], [0], [0], [1], [0, 0, 1, 1], [], []>} : vector<16x64xf32>, vector<64x32xf32>, vector<16x32xf32> -> vector<16x32xf32>
    %c1_115 = arith.constant 1 : index
    %c0_116 = arith.constant 0 : index
    %c0_117 = arith.constant 0 : index
    %295 = vector.load %arg13[%c1_115, %c0_116, %c0_117] : memref<2x1x32xf32, #tpu.memory_space<vmem>>, vector<1x1x32xf32>
    %296 = vector.shape_cast %295 : vector<1x1x32xf32> to vector<1x32xf32>
    %297 = vector.broadcast %296 : vector<1x32xf32> to vector<16x32xf32>
    %298 = arith.addf %294, %297 : vector<16x32xf32>
    %299 = arith.addf %298, %271 : vector<16x32xf32>
    %c1_118 = arith.constant 1 : index
    %c0_119 = arith.constant 0 : index
    %c0_120 = arith.constant 0 : index
    %300 = vector.load %arg14[%c1_118, %c0_119, %c0_120] : memref<2x1x32xf32, #tpu.memory_space<vmem>>, vector<1x1x32xf32>
    %301 = vector.shape_cast %300 : vector<1x1x32xf32> to vector<1x32xf32>
    %c1_121 = arith.constant 1 : index
    %c0_122 = arith.constant 0 : index
    %c0_123 = arith.constant 0 : index
    %302 = vector.load %arg15[%c1_121, %c0_122, %c0_123] : memref<2x1x32xf32, #tpu.memory_space<vmem>>, vector<1x1x32xf32>
    %303 = vector.shape_cast %302 : vector<1x1x32xf32> to vector<1x32xf32>
    %cst_124 = arith.constant dense<0.000000e+00> : vector<16xf32>
    %304 = vector.multi_reduction <add>, %299, %cst_124 [1] : vector<16x32xf32> to vector<16xf32>
    %305 = vector.shape_cast %304 : vector<16xf32> to vector<16x1xf32>
    %cst_125 = arith.constant 3.200000e+01 : f32
    %306 = vector.broadcast %cst_125 : f32 to vector<16x1xf32>
    %307 = arith.divf %305, %306 : vector<16x1xf32>
    %308 = vector.broadcast %307 : vector<16x1xf32> to vector<16x32xf32>
    %309 = arith.subf %299, %308 : vector<16x32xf32>
    %310 = arith.mulf %309, %309 : vector<16x32xf32>
    %cst_126 = arith.constant dense<0.000000e+00> : vector<16xf32>
    %311 = vector.multi_reduction <add>, %310, %cst_126 [1] : vector<16x32xf32> to vector<16xf32>
    %312 = vector.shape_cast %311 : vector<16xf32> to vector<16x1xf32>
    %cst_127 = arith.constant 3.200000e+01 : f32
    %313 = vector.broadcast %cst_127 : f32 to vector<16x1xf32>
    %314 = arith.divf %312, %313 : vector<16x1xf32>
    %315 = vector.broadcast %307 : vector<16x1xf32> to vector<16x32xf32>
    %316 = arith.subf %299, %315 : vector<16x32xf32>
    %cst_128 = arith.constant 9.99999974E-6 : f32
    %317 = vector.broadcast %cst_128 : f32 to vector<16x1xf32>
    %318 = arith.addf %314, %317 : vector<16x1xf32>
    %319 = math.rsqrt %318 : vector<16x1xf32>
    %320 = vector.broadcast %319 : vector<16x1xf32> to vector<16x32xf32>
    %321 = arith.mulf %316, %320 : vector<16x32xf32>
    %322 = vector.broadcast %301 : vector<1x32xf32> to vector<16x32xf32>
    %323 = arith.mulf %321, %322 : vector<16x32xf32>
    %324 = vector.broadcast %303 : vector<1x32xf32> to vector<16x32xf32>
    %325 = arith.addf %323, %324 : vector<16x32xf32>
    %326 = vector.extract_strided_slice %325 {offsets = [0, 0], sizes = [1, 32], strides = [1, 1]} : vector<16x32xf32> to vector<1x32xf32>
    %327 = vector.extract_strided_slice %325 {offsets = [8, 0], sizes = [1, 32], strides = [1, 1]} : vector<16x32xf32> to vector<1x32xf32>
    %328 = tpu.concatenate %326, %327 in 0 : vector<1x32xf32>, vector<1x32xf32> -> vector<2x32xf32>
    %c0_129 = arith.constant 0 : index
    %c0_130 = arith.constant 0 : index
    %329 = vector.load %arg16[%c0_129, %c0_130] : memref<32x32xf32, #tpu.memory_space<vmem>>, vector<32x32xf32>
    %cst_131 = arith.constant dense<0.000000e+00> : vector<2x32xf32>
    %330 = tpu.matmul %328, %329, %cst_131 {dimension_numbers = #tpu.dot_dimension_numbers<[1], [0], [0], [1], [0, 0, 1, 1], [], []>} : vector<2x32xf32>, vector<32x32xf32>, vector<2x32xf32> -> vector<2x32xf32>
    %c0_132 = arith.constant 0 : index
    %c0_133 = arith.constant 0 : index
    %331 = vector.load %arg17[%c0_132, %c0_133] : memref<1x32xf32, #tpu.memory_space<vmem>>, vector<1x32xf32>
    %332 = vector.broadcast %331 : vector<1x32xf32> to vector<2x32xf32>
    %333 = arith.addf %330, %332 : vector<2x32xf32>
    %334 = math.tanh %333 : vector<2x32xf32>
    %c0_134 = arith.constant 0 : index
    %c0_135 = arith.constant 0 : index
    %335 = vector.load %arg18[%c0_134, %c0_135] : memref<32x128xf32, #tpu.memory_space<vmem>>, vector<32x128xf32>
    %cst_136 = arith.constant dense<0.000000e+00> : vector<2x128xf32>
    %336 = tpu.matmul %334, %335, %cst_136 {dimension_numbers = #tpu.dot_dimension_numbers<[1], [0], [0], [1], [0, 0, 1, 1], [], []>} : vector<2x32xf32>, vector<32x128xf32>, vector<2x128xf32> -> vector<2x128xf32>
    %c0_137 = arith.constant 0 : index
    %c0_138 = arith.constant 0 : index
    %337 = vector.load %arg19[%c0_137, %c0_138] : memref<1x128xf32, #tpu.memory_space<vmem>>, vector<1x128xf32>
    %338 = vector.broadcast %337 : vector<1x128xf32> to vector<2x128xf32>
    %339 = arith.addf %336, %338 : vector<2x128xf32>
    %c0_139 = arith.constant 0 : index
    %c0_140 = arith.constant 0 : index
    %340 = vector.load %arg20[%c0_139, %c0_140] : memref<2x128xf32, #tpu.memory_space<vmem>>, vector<2x128xf32>
    tpu.vector_store %arg20[%c0_139, %c0_140], %339 {strides = array<i32>} : memref<2x128xf32, #tpu.memory_space<vmem>>, vector<2x128xf32>,
    return
  }
}

</mosaic_0001>

<bundles_post_ra>
// kernel: longformer_forward.1
= control target key start
LH: loop header
LB: loop body
LE: loop exit
PB: predicated region body
PF: predicated region fallthrough
CT: control target
= control target key end

     0   :  { %vm69_vm0 = vcmask 261120   ;;  %vm225_vm1 = vcmask 64512   ;;  %s3548_s28 = smov 112   ;;  %s3550_s29 = smov 96   ;;  %vm586_vm2 = vcmask 130048   ;;  %vm1051_vm3 = vcmask 195584   ;;  %s4242_s0 = inlined_call_operand.vmem [shape: f32[16,32], index: 0, kind: input, shape index: {}]   ;;  %s4243_s4 = inlined_call_operand.vmem [shape: f32[2,32,96], index: 4, kind: input, shape index: {}]   ;;  %s4244_s2 = inlined_call_operand.vmem [shape: f32[1,32], index: 2, kind: input, shape index: {}]   ;;  %s4245_s3 = inlined_call_operand.vmem [shape: f32[1,32], index: 3, kind: input, shape index: {}]   ;;  %s4246_s5 = inlined_call_operand.vmem [shape: f32[2,1,96], index: 5, kind: input, shape index: {}]   ;;  %s4247_s1 = inlined_call_operand.vmem [shape: f32[1,16,16], index: 1, kind: input, shape index: {}]   ;;  %s4248_s6 = inlined_call_operand.vmem [shape: f32[2,32,32], index: 6, kind: input, shape index: {}]   ;;  %s4249_s7 = inlined_call_operand.vmem [shape: f32[2,1,32], index: 7, kind: input, shape index: {}]   ;;  %s4250_s10 = inlined_call_operand.vmem [shape: f32[2,32,64], index: 10, kind: input, shape index: {}]   ;;  %s4251_s8 = inlined_call_operand.vmem [shape: f32[2,1,32], index: 8, kind: input, shape index: {}]   ;;  %s4252_s9 = inlined_call_operand.vmem [shape: f32[2,1,32], index: 9, kind: input, shape index: {}]   ;;  %s4253_s12 = inlined_call_operand.vmem [shape: f32[2,64,32], index: 12, kind: input, shape index: {}]   ;;  %s4254_s11 = inlined_call_operand.vmem [shape: f32[2,1,64], index: 11, kind: input, shape index: {}]   ;;  %s4255_s13 = inlined_call_operand.vmem [shape: f32[2,1,32], index: 13, kind: input, shape index: {}]   ;;  %s4256_s14 = inlined_call_operand.vmem [shape: f32[2,1,32], index: 14, kind: input, shape index: {}]   ;;  %s4257_s15 = inlined_call_operand.vmem [shape: f32[2,1,32], index: 15, kind: input, shape index: {}]   ;;  %s4258_s16 = inlined_call_operand.vmem [shape: f32[32,32], index: 16, kind: input, shape index: {}]   ;;  %s4259_s18 = inlined_call_operand.vmem [shape: f32[32,128], index: 18, kind: input, shape index: {}]   ;;  %s4260_s17 = inlined_call_operand.vmem [shape: f32[1,32], index: 17, kind: input, shape index: {}]   ;;  %s4261_s19 = inlined_call_operand.vmem [shape: f32[1,128], index: 19, kind: input, shape index: {}]   ;;  %s4262_s20 = inlined_call_operand.vmem [shape: f32[2,128], index: 20, kind: output, shape index: {}]  }
   0x1   :  { %4270 = sst [smem:[#allocation2_spill]] %s4242_s0  ;;  %s3551_s30 = smov 104   ;;  %v3781_v54 = vld [vmem:[%s4247_s1 + $0x8] sm:$0xff]  ;;  %v3786_v57 = vld [vmem:[%s4247_s1] sm:$0xff]  ;;  %vm1317_vm4 = vcmask 523264   ;;  %vm3557_vm5 = vmmov 0  }
   0x2   :  { %4271 = sst [smem:[#allocation3_spill]] %s4243_s4  ;;  %s3552_s1 = smov 64   ;;  %vm2786_vm6 = vcmask 1040384  }
   0x3   :  { %4272 = sst [smem:[#allocation4_spill]] %s4244_s2  ;;  %s4266_s24 = smov 24  }
   0x4   :  { %4273 = sst [smem:[#allocation5_spill]] %s4245_s3  ;;  %s4280_s25 = smov 16  }
   0x5   :  { %4274 = sst [smem:[#allocation6_spill]] %s4246_s5  ;;  %s3549_s5 = smov 120  }
   0x6   :  { %s4275_s23 = sld [smem:[#allocation2_spill]]  ;;  %s4281_s3 = smov 24  }
   0x7   :  { %s4276_s26 = sld [smem:[#allocation3_spill]] }
   0x8   :  { %s4277_s22 = sld [smem:[#allocation4_spill]] }
   0x9   :  { %s4278_s2 = sld [smem:[#allocation5_spill]] }
   0xa   :  { %s4279_s27 = sld [smem:[#allocation6_spill]] }
   0xc   :  { %v65_v0 = vld [vmem:[%s4275_s23] sm:$0xff]  ;;  %v66_v1 = vld [vmem:[%s4275_s23 + $0x8] sm:$0xff]  ;;  %s4268_s23 = smov 16  }
   0xd   :  { %v70_v2 = vsel %vm69_vm0, %v65_v0, 0.0  ;;  %v73_v3 = vsel %vm69_vm0, %v66_v1, 0.0  ;;  %v118_v14 = vld [vmem:[%s4276_s26 + $0x18] sm:$0xff]  ;;  %v117_v15 = vld [vmem:[%s4276_s26 + $0x10] sm:$0xff]  ;;  %v116_v16 = vld [vmem:[%s4276_s26 + $0x8] sm:$0xff] }
   0xe   :  { %71 = vadd.xlane.f32.xlu0 %v70_v2  ;;  %3206 = vmatprep.subr.mxu0 %v118_v14  ;;  %v115_v17 = vld [vmem:[%s4276_s26] sm:$0xff] }
   0xf   :  { %3207 = vmatpush3.msra.mxu0 %v118_v14  ;;  %v2962_v25 = vld [vmem:[%s4277_s22] ss:$0 sm:$0xff]  ;;  %s3553_s22 = smov 8  }
  0x10   :  { %3208 = vmatprep.subr.mxu0 %v117_v15  ;;  %v2963_v27 = vld [vmem:[%s4278_s2] ss:$0 sm:$0xff] }
  0x11   :  { %3209 = vmatpush3.msra.mxu0 %v117_v15  ;;  %v2964_v34 = vld [vmem:[%s4279_s27] ss:$0 sm:$0xff] }
  0x12   :  { %74 = vadd.xlane.f32.xlu0 %v73_v3  ;;  %3210 = vmatprep.subr.mxu0 %v116_v16 }
  0x13   :  { %3211 = vmatpush3.msra.mxu0 %v116_v16 }
  0x14   :  { %3212 = vmatprep.subr.mxu0 %v115_v17 }
  0x15   :  { %3213 = vmatpush3.msra.mxu0 %v115_v17 }
  0x97   :  { %v72_v4 = vpop.xlane.xlu0 %71 }
  0x98   :  { %v77_v5 = vmul.f32 0.03125, %v72_v4 }
  0x9a   :  { %v79_v6 = vsub.f32 %v65_v0, %v77_v5 }
  0x9b   :  { %v75_v7 = vpop.xlane.xlu0 %74 }
  0x9c   :  { %v78_v8 = vmul.f32 0.03125, %v75_v7  ;;  %v81_v9 = vmul.f32 %v79_v6, %v79_v6 }
  0x9e   :  { %v80_v10 = vsub.f32 %v66_v1, %v78_v8  ;;  %v83_v11 = vsel %vm69_vm0, %v81_v9, 0.0 }
  0x9f   :  { %84 = vadd.xlane.f32.xlu1 %v83_v11 }
  0xa0   :  { %v82_v12 = vmul.f32 %v80_v10, %v80_v10 }
  0xa2   :  { %v86_v13 = vsel %vm69_vm0, %v82_v12, 0.0 }
  0xa3   :  { %87 = vadd.xlane.f32.xlu1 %v86_v13 }
 0x128   :  { %v85_v18 = vpop.xlane.xlu1 %84 }
 0x129   :  { %v89_v19 = vmul.f32 0.03125, %v85_v18 }
 0x12b   :  { %v91_v20 = vadd.f32 1e-05, %v89_v19 }
 0x12c   :  { %v88_v21 = vpop.xlane.xlu1 %87 }
 0x12d   :  { %3454 = vrsqrt.f32 %v91_v20  ;;  %v90_v22 = vmul.f32 0.03125, %v88_v21 }
 0x12f   :  { %v92_v23 = vadd.f32 1e-05, %v90_v22 }
 0x131   :  { %3456 = vrsqrt.f32 %v92_v23 }
 0x13a   :  { %v3455_v24 = vpop.eup %3454 }
 0x13b   :  { %v95_v26 = vmul.f32 %v3455_v24, %v79_v6 }
 0x13d   :  { %v103_v28 = vmul.f32 %v2962_v25, %v95_v26 }
 0x13e   :  { %v3457_v29 = vpop.eup %3456 }
 0x13f   :  { %v96_v30 = vmul.f32 %v3457_v29, %v80_v10  ;;  %v3691_v31 = vadd.f32 %v2963_v27, %v103_v28 }
 0x141   :  { %v104_v32 = vmul.f32 %v2962_v25, %v96_v30  ;;  %3214 = vmatprep.mubr.msk.f32.mxu0 %vm69_vm0, %v3691_v31 }
 0x143   :  { %v3695_v33 = vadd.f32 %v2963_v27, %v104_v32 }
 0x145   :  { %3215 = vmatmul.mubr.msk.f32.vlgmr.msra.gmra.mxu0 %vm69_vm0, %v3695_v33 }
 0x205   :  { %v3216_v35 = vpop.f32.mrf.mxu0 }
 0x206   :  { %v3702_v36 = vadd.f32 %v3216_v35, %v2964_v34 }
 0x207   :  { %v198_v37 = vpop.f32.mrf.mxu0 }
 0x208   :  { %v3704_v38 = vadd.f32 %v2964_v34, %v198_v37  ;;  %215 = vrot.lane.b32.xlu1 %v3702_v36, %s3548_s28  ;;  %211 = vrot.lane.b32.xlu0 %v3702_v36, %s3549_s5 }
 0x20a   :  { %3221 = vmatprep.mubr.msk.f32.mxu1 %vm225_vm1, %v3704_v38 }
 0x20c   :  { %213 = vrot.lane.b32.xlu0 %v3704_v38, %s3548_s28  ;;  %209 = vrot.lane.b32.xlu1 %v3704_v38, %s3549_s5 }
 0x210   :  { %223 = vrot.lane.b32.xlu0 %v3702_v36, %s3550_s29  ;;  %219 = vrot.lane.b32.xlu1 %v3702_v36, %s3551_s30 }
 0x214   :  { %221 = vrot.lane.b32.xlu0 %v3704_v38, %s3550_s29  ;;  %217 = vrot.lane.b32.xlu1 %v3704_v38, %s3551_s30 }
 0x27a   :  { %v3724_v39 = vpop.permute.xlu1 %215  ;;  %v3726_v40 = vpop.permute.xlu0 %211 }
 0x27b   :  { %398 = vrot.lane.b32.xlu0 %v3724_v39, %s3550_s29  ;;  %311 = vrot.lane.b32.xlu1 %v3726_v40, %s3550_s29 }
 0x27e   :  { %v3732_v41 = vpop.permute.xlu0 %213  ;;  %v3734_v42 = vpop.permute.xlu1 %209 }
 0x27f   :  { %396 = vrot.lane.b32.xlu0 %v3732_v41, %s3550_s29  ;;  %3228 = vmatprep.mubr.msk.f32.mxu0 %vm225_vm1, %v3734_v42 }
 0x280   :  { %309 = vrot.lane.b32.xlu1 %v3734_v42, %s3550_s29 }
 0x282   :  { %v224_v43 = vpop.permute.xlu0 %223  ;;  %v3742_v44 = vpop.permute.xlu1 %219 }
 0x283   :  { %3217 = vmatprep.subr.msk.mxu1 %vm225_vm1, %v224_v43 }
 0x284   :  { %485 = vrot.lane.b32.xlu1 %v3742_v44, %s3550_s29  ;;  %3218 = vmatpush3.xpose.msk.msra.mxu1 %vm225_vm1, %v224_v43 }
 0x286   :  { %v222_v45 = vpop.permute.xlu0 %221  ;;  %v3748_v46 = vpop.permute.xlu1 %217 }
 0x287   :  { %3219 = vmatprep.subr.msk.mxu1 %vm225_vm1, %v222_v45 }
 0x288   :  { %483 = vrot.lane.b32.xlu1 %v3748_v46, %s3550_s29  ;;  %3220 = vmatpush3.xpose.msk.msra.mxu1 %vm225_vm1, %v222_v45 }
 0x28b   :  { %3222 = vmatmul.mubr.msk.f32.vlgmr.msra.gmra.mxu1 %vm225_vm1, %v3702_v36 }
 0x28c   :  { %3235 = vmatprep.mubr.msk.f32.mxu1 %vm225_vm1, %v3732_v41 }
 0x2ed   :  { %v399_v47 = vpop.permute.xlu0 %398  ;;  %v312_v48 = vpop.permute.xlu1 %311 }
 0x2ee   :  { %3224 = vmatprep.subr.msk.mxu0 %vm225_vm1, %v312_v48  ;;  %3231 = vmatprep.subr.msk.mxu1 %vm225_vm1, %v399_v47 }
 0x2ef   :  { %3225 = vmatpush3.xpose.msk.msra.mxu0 %vm225_vm1, %v312_v48  ;;  %3232 = vmatpush3.xpose.msk.msra.mxu1 %vm225_vm1, %v399_v47 }
 0x2f1   :  { %v397_v49 = vpop.permute.xlu0 %396 }
 0x2f2   :  { %v310_v50 = vpop.permute.xlu1 %309  ;;  %3233 = vmatprep.subr.msk.mxu1 %vm225_vm1, %v397_v49 }
 0x2f3   :  { %3226 = vmatprep.subr.msk.mxu0 %vm225_vm1, %v310_v50  ;;  %3234 = vmatpush3.xpose.msk.msra.mxu1 %vm225_vm1, %v397_v49 }
 0x2f4   :  { %3227 = vmatpush3.xpose.msk.msra.mxu0 %vm225_vm1, %v310_v50 }
 0x2f6   :  { %v486_v51 = vpop.permute.xlu1 %485  ;;  %3236 = vmatmul.mubr.msk.f32.vlgmr.msra.gmra.mxu1 %vm225_vm1, %v3724_v39 }
 0x2f7   :  { %3229 = vmatmul.mubr.msk.f32.vlgmr.msra.gmra.mxu0 %vm225_vm1, %v3726_v40  ;;  %3238 = vmatprep.subr.msk.mxu0 %vm225_vm1, %v486_v51 }
 0x2f8   :  { %3239 = vmatpush3.xpose.msk.msra.mxu0 %vm225_vm1, %v486_v51  ;;  %3242 = vmatprep.mubr.msk.f32.mxu0 %vm225_vm1, %v3748_v46 }
 0x2fa   :  { %v484_v52 = vpop.permute.xlu1 %483 }
 0x2fb   :  { %3240 = vmatprep.subr.msk.mxu0 %vm225_vm1, %v484_v52 }
 0x2fc   :  { %3241 = vmatpush3.xpose.msk.msra.mxu0 %vm225_vm1, %v484_v52 }
 0x2ff   :  { %3243 = vmatmul.mubr.msk.f32.vlgmr.msra.gmra.mxu0 %vm225_vm1, %v3742_v44 }
 0x34b   :  { %v3223_v53 = vpop.f32.mrf.mxu1 }
 0x34c   :  { %v571_v55 = vmul.f32 0.35355338, %v3223_v53 }
 0x34d   :  { %v300_v56 = vpop.f32.mrf.mxu1 }
 0x34e   :  { %v570_v58 = vmul.f32 0.35355338, %v300_v56  ;;  %v579_v59 = vadd.f32 %v571_v55, %v3781_v54 }
 0x350   :  { %v590_v60 = vsel %vm586_vm2, %v579_v59, -inf  ;;  %v578_v61 = vadd.f32 %v570_v58, %v3786_v57 }
 0x351   :  { %591 = vmax.xlane.f32.xlu1 %v590_v60 }
 0x352   :  { %v587_v62 = vsel %vm586_vm2, %v578_v61, -inf }
 0x353   :  { %588 = vmax.xlane.f32.xlu0 %v587_v62 }
 0x3b6   :  { %v3237_v63 = vpop.f32.mrf.mxu1 }
 0x3b7   :  { %v3230_v0 = vpop.f32.mrf.mxu0  ;;  %v575_v1 = vmul.f32 0.35355338, %v3237_v63 }
 0x3b8   :  { %v573_v2 = vmul.f32 0.35355338, %v3230_v0  ;;  %v474_v4 = vpop.f32.mrf.mxu1 }
 0x3b9   :  { %v387_v3 = vpop.f32.mrf.mxu0  ;;  %v583_v5 = vadd.f32 %v575_v1, %v3781_v54  ;;  %v574_v9 = vmul.f32 0.35355338, %v474_v4 }
 0x3ba   :  { %v572_v6 = vmul.f32 0.35355338, %v387_v3  ;;  %v581_v7 = vadd.f32 %v573_v2, %v3781_v54 }
 0x3bb   :  { %v602_v8 = vsel %vm586_vm2, %v583_v5, -inf  ;;  %v582_v15 = vadd.f32 %v574_v9, %v3786_v57 }
 0x3bc   :  { %v596_v10 = vsel %vm586_vm2, %v581_v7, -inf  ;;  %603 = vmax.xlane.f32.xlu1 %v602_v8  ;;  %v580_v11 = vadd.f32 %v572_v6, %v3786_v57 }
 0x3bd   :  { %597 = vmax.xlane.f32.xlu0 %v596_v10  ;;  %v599_v20 = vsel %vm586_vm2, %v582_v15, -inf }
 0x3be   :  { %v593_v14 = vsel %vm586_vm2, %v580_v11, -inf }
 0x3bf   :  { %v3244_v12 = vpop.f32.mrf.mxu0 }
 0x3c0   :  { %v577_v13 = vmul.f32 0.35355338, %v3244_v12 }
 0x3c1   :  { %v561_v16 = vpop.f32.mrf.mxu0  ;;  %594 = vmax.xlane.f32.xlu0 %v593_v14 }
 0x3c2   :  { %v576_v17 = vmul.f32 0.35355338, %v561_v16  ;;  %v585_v18 = vadd.f32 %v577_v13, %v3781_v54 }
 0x3c4   :  { %v608_v19 = vsel %vm586_vm2, %v585_v18, -inf  ;;  %v584_v21 = vadd.f32 %v576_v17, %v3786_v57 }
 0x3c5   :  { %609 = vmax.xlane.f32.xlu1 %v608_v19  ;;  %600 = vmax.xlane.f32.xlu0 %v599_v20 }
 0x3c6   :  { %v605_v22 = vsel %vm586_vm2, %v584_v21, -inf }
 0x3c9   :  { %606 = vmax.xlane.f32.xlu0 %v605_v22 }
 0x3d6   :  { %675 = vrot.lane.b32.xlu1 %v3704_v38, %s3552_s1 }
 0x3da   :  { %764 = vrot.lane.b32.xlu1 %v3726_v40, %s3552_s1  ;;  %v592_v25 = vpop.xlane.xlu1 %591 }
 0x3db   :  { %v612_v26 = vsub.f32 %v579_v59, %v592_v25 }
 0x3dc   :  { %v589_v23 = vpop.xlane.xlu0 %588 }
 0x3dd   :  { %v611_v24 = vsub.f32 %v578_v61, %v589_v23  ;;  %v621_v28 = vmul.f32 1.442695, %v612_v26 }
 0x3de   :  { %762 = vrot.lane.b32.xlu1 %v3734_v42, %s3552_s1 }
 0x3df   :  { %677 = vrot.lane.b32.xlu0 %v3702_v36, %s3552_s1  ;;  %v619_v27 = vmul.f32 1.442695, %v611_v24 }
 0x3e1   :  { %3458 = vpow2.f32 %v619_v27 }
 0x3e2   :  { %938 = vrot.lane.b32.xlu1 %v3742_v44, %s3552_s1  ;;  %3460 = vpow2.f32 %v621_v28 }
 0x3e3   :  { %851 = vrot.lane.b32.xlu0 %v3724_v39, %s3552_s1 }
 0x3ee   :  { %v3816_v29 = vpop.eup %3458 }
 0x3ef   :  { %v635_v30 = vsel %vm586_vm2, %v3816_v29, 0.0  ;;  %v3820_v32 = vpop.eup %3460 }
 0x3f0   :  { %v638_v34 = vsel %vm586_vm2, %v3820_v32, 0.0 }
 0x402   :  { %636 = vadd.xlane.f32.xlu0 %v635_v30 }
 0x406   :  { %639 = vadd.xlane.f32.xlu1 %v638_v34 }
 0x445   :  { %v604_v35 = vpop.xlane.xlu1 %603 }
 0x446   :  { %v598_v36 = vpop.xlane.xlu0 %597  ;;  %v616_v37 = vsub.f32 %v583_v5, %v604_v35 }
 0x447   :  { %v614_v38 = vsub.f32 %v581_v7, %v598_v36 }
 0x448   :  { %v629_v40 = vmul.f32 1.442695, %v616_v37  ;;  %v1057_v37 = vld [vmem:[%s4248_s6 + $0x18] sm:$0xff] }
 0x449   :  { %v625_v39 = vmul.f32 1.442695, %v614_v38 }
 0x44a   :  { %v595_v42 = vpop.xlane.xlu0 %594 }
 0x44b   :  { %3462 = vpow2.f32 %v625_v39  ;;  %v613_v43 = vsub.f32 %v580_v11, %v595_v42  ;;  %v1056_v39 = vld [vmem:[%s4248_s6 + $0x10] sm:$0xff] }
 0x44c   :  { %3464 = vpow2.f32 %v629_v40  ;;  %v1055_v40 = vld [vmem:[%s4248_s6 + $0x8] sm:$0xff] }
 0x44d   :  { %v623_v44 = vmul.f32 1.442695, %v613_v43  ;;  %v1054_v43 = vld [vmem:[%s4248_s6] sm:$0xff] }
 0x44e   :  { %v610_v45 = vpop.xlane.xlu1 %609  ;;  %v601_v47 = vpop.xlane.xlu0 %600 }
 0x44f   :  { %3466 = vpow2.f32 %v623_v44  ;;  %v618_v48 = vsub.f32 %v585_v18, %v610_v45  ;;  %v615_v49 = vsub.f32 %v582_v15, %v601_v47 }
 0x451   :  { %v633_v50 = vmul.f32 1.442695, %v618_v48  ;;  %v627_v51 = vmul.f32 1.442695, %v615_v49 }
 0x452   :  { %v607_v52 = vpop.xlane.xlu0 %606  ;;  %v676_v55 = vpop.permute.xlu1 %675 }
 0x453   :  { %3468 = vpow2.f32 %v633_v50  ;;  %v617_v53 = vsub.f32 %v584_v21, %v607_v52 }
 0x454   :  { %3470 = vpow2.f32 %v627_v51 }
 0x455   :  { %v631_v56 = vmul.f32 1.442695, %v617_v53 }
 0x456   :  { %v678_v58 = vpop.permute.xlu0 %677  ;;  %v765_v62 = vpop.permute.xlu1 %764 }
 0x457   :  { %3472 = vpow2.f32 %v631_v56  ;;  %3245 = vmatprep.subr.mxu1 %v678_v58 }
 0x458   :  { %v3463_v59 = vpop.eup %3462  ;;  %3246 = vmatpush3.msra.mxu1 %v678_v58 }
 0x459   :  { %3247 = vmatprep.subr.mxu1 %v676_v55  ;;  %v644_v60 = vsel %vm586_vm2, %v3463_v59, 0.0  ;;  %v3825_v61 = vpop.eup %3464 }
 0x45a   :  { %645 = vadd.xlane.f32.xlu1 %v644_v60  ;;  %3248 = vmatpush3.msra.mxu1 %v676_v55  ;;  %v852_v63 = vpop.permute.xlu0 %851  ;;  %v650_v1 = vsel %vm586_vm2, %v3825_v61, 0.0  ;;  %v763_v9 = vpop.permute.xlu1 %762 }
 0x45b   :  { %3252 = vmatprep.subr.mxu1 %v765_v62  ;;  %3259 = vmatprep.subr.mxu0 %v852_v63 }
 0x45c   :  { %v3467_v0 = vpop.eup %3466  ;;  %3260 = vmatpush3.msra.mxu0 %v852_v63 }
 0x45d   :  { %v641_v2 = vsel %vm586_vm2, %v3467_v0, 0.0 }
 0x45e   :  { %651 = vadd.xlane.f32.xlu1 %v650_v1  ;;  %642 = vadd.xlane.f32.xlu0 %v641_v2  ;;  %v939_v10 = vpop.permute.xlu1 %938  ;;  %v2991_v1 = vld [vmem:[%s4249_s7] ss:$0 sm:$0xff] }
 0x460   :  { %v3469_v3 = vpop.eup %3468 }
 0x461   :  { %v3471_v4 = vpop.eup %3470  ;;  %v656_v5 = vsel %vm586_vm2, %v3469_v3, 0.0 }
 0x462   :  { %657 = vadd.xlane.f32.xlu1 %v656_v5  ;;  %v647_v6 = vsel %vm586_vm2, %v3471_v4, 0.0 }
 0x463   :  { %648 = vadd.xlane.f32.xlu0 %v647_v6 }
 0x464   :  { %v3473_v7 = vpop.eup %3472 }
 0x465   :  { %v653_v8 = vsel %vm586_vm2, %v3473_v7, 0.0 }
 0x467   :  { %654 = vadd.xlane.f32.xlu0 %v653_v8 }
 0x473   :  { %936 = vrot.lane.b32.xlu1 %v3748_v46, %s3552_s1 }
 0x47d   :  { %849 = vrot.lane.b32.xlu0 %v3732_v41, %s3552_s1 }
 0x48b   :  { %v637_v11 = vpop.xlane.xlu0 %636 }
 0x48c   :  { %3474 = vrcp.f32 %v637_v11 }
 0x48f   :  { %v640_v12 = vpop.xlane.xlu1 %639 }
 0x490   :  { %3476 = vrcp.f32 %v640_v12 }
 0x499   :  { %v3475_v13 = vpop.eup %3474 }
 0x49a   :  { %v667_v14 = vmul.f32 %v3475_v13, %v3816_v29 }
 0x49c   :  { %3249 = vmatprep.mubr.msk.f32.mxu1 %vm586_vm2, %v667_v14 }
 0x49d   :  { %v3477_v15 = vpop.eup %3476 }
 0x49e   :  { %v668_v16 = vmul.f32 %v3477_v15, %v3820_v32 }
 0x4a0   :  { %3250 = vmatmul.mubr.msk.f32.vlgmr.msra.gmra.mxu1 %vm586_vm2, %v668_v16 }
 0x4a1   :  { %3253 = vmatpush3.msra.mxu1 %v765_v62 }
 0x4a2   :  { %3254 = vmatprep.subr.mxu1 %v763_v9 }
 0x4a3   :  { %3255 = vmatpush3.msra.mxu1 %v763_v9 }
 0x4a4   :  { %3266 = vmatprep.subr.mxu1 %v939_v10 }
 0x4e3   :  { %v646_v41 = vpop.xlane.xlu1 %645 }
 0x4e4   :  { %3478 = vrcp.f32 %v646_v41 }
 0x4e7   :  { %v652_v46 = vpop.xlane.xlu1 %651  ;;  %v643_v17 = vpop.xlane.xlu0 %642 }
 0x4e8   :  { %3480 = vrcp.f32 %v643_v17  ;;  %v1194_v17 = vld [vmem:[%s4250_s10 + $0x10] sm:$0xff] }
 0x4e9   :  { %3482 = vrcp.f32 %v652_v46 }
 0x4eb   :  { %v658_v19 = vpop.xlane.xlu1 %657 }
 0x4ec   :  { %v649_v18 = vpop.xlane.xlu0 %648 }
 0x4ed   :  { %3484 = vrcp.f32 %v649_v18  ;;  %v1193_v18 = vld [vmem:[%s4250_s10 + $0x8] sm:$0xff] }
 0x4ee   :  { %3486 = vrcp.f32 %v658_v19  ;;  %v1192_v19 = vld [vmem:[%s4250_s10] sm:$0xff] }
 0x4ef   :  { %v937_v28 = vpop.permute.xlu1 %936 }
 0x4f0   :  { %v655_v20 = vpop.xlane.xlu0 %654 }
 0x4f1   :  { %3488 = vrcp.f32 %v655_v20  ;;  %v3479_v22 = vpop.eup %3478 }
 0x4f2   :  { %v670_v25 = vmul.f32 %v3479_v22, %v3463_v59 }
 0x4f4   :  { %v850_v21 = vpop.permute.xlu0 %849 }
 0x4f5   :  { %3261 = vmatprep.subr.mxu0 %v850_v21  ;;  %v3481_v23 = vpop.eup %3480 }
 0x4f6   :  { %3262 = vmatpush3.msra.mxu0 %v850_v21  ;;  %v669_v24 = vmul.f32 %v3481_v23, %v3467_v0  ;;  %v3483_v26 = vpop.eup %3482 }
 0x4f7   :  { %v672_v30 = vmul.f32 %v3483_v26, %v3825_v61  ;;  %3273 = vmatprep.subr.mxu0 %v1057_v37 }
 0x4f8   :  { %3256 = vmatprep.mubr.msk.f32.mxu1 %vm586_vm2, %v669_v24 }
 0x4f9   :  { %3257 = vmatmul.mubr.msk.f32.vlgmr.msra.gmra.mxu1 %vm586_vm2, %v670_v25 }
 0x4fa   :  { %v3485_v27 = vpop.eup %3484  ;;  %3267 = vmatpush3.msra.mxu1 %v939_v10 }
 0x4fb   :  { %v671_v29 = vmul.f32 %v3485_v27, %v3471_v4  ;;  %3268 = vmatprep.subr.mxu1 %v937_v28  ;;  %v3487_v32 = vpop.eup %3486  ;;  %v2994_v27 = vld [vmem:[%s4251_s8] ss:$0 sm:$0xff] }
 0x4fc   :  { %3269 = vmatpush3.msra.mxu1 %v937_v28  ;;  %v674_v36 = vmul.f32 %v3487_v32, %v3469_v3 }
 0x4fd   :  { %3263 = vmatprep.mubr.msk.f32.mxu0 %vm586_vm2, %v671_v29  ;;  %v2995_v29 = vld [vmem:[%s4252_s9] ss:$0 sm:$0xff] }
 0x4fe   :  { %v3489_v34 = vpop.eup %3488  ;;  %3264 = vmatmul.mubr.msk.f32.vlgmr.msra.gmra.mxu0 %vm586_vm2, %v672_v30 }
 0x4ff   :  { %v673_v35 = vmul.f32 %v3489_v34, %v3473_v7  ;;  %3274 = vmatpush3.msra.mxu0 %v1057_v37 }
 0x500   :  { %3275 = vmatprep.subr.mxu0 %v1056_v39 }
 0x501   :  { %3270 = vmatprep.mubr.msk.f32.mxu1 %vm586_vm2, %v673_v35  ;;  %3276 = vmatpush3.msra.mxu0 %v1056_v39  ;;  %v1308_v39 = vld [vmem:[%s4253_s12 + $0x30] sm:$0xff] }
 0x502   :  { %3271 = vmatmul.mubr.msk.f32.vlgmr.msra.gmra.mxu1 %vm586_vm2, %v674_v36  ;;  %3277 = vmatprep.subr.mxu0 %v1055_v40 }
 0x503   :  { %3278 = vmatpush3.msra.mxu0 %v1055_v40  ;;  %v1307_v40 = vld [vmem:[%s4253_s12 + $0x28] sm:$0xff] }
 0x504   :  { %3279 = vmatprep.subr.mxu0 %v1054_v43 }
 0x505   :  { %3280 = vmatpush3.msra.mxu0 %v1054_v43  ;;  %v1305_v43 = vld [vmem:[%s4253_s12 + $0x18] sm:$0xff] }
 0x560   :  { %v3251_v38 = vpop.f32.mrf.mxu1 }
 0x562   :  { %v753_v42 = vpop.f32.mrf.mxu1 }
 0x5b9   :  { %v3258_v44 = vpop.f32.mrf.mxu1 }
 0x5ba   :  { %1027 = vrot.lane.b32.xlu1 %v3258_v44, %s3553_s22  ;;  %v1304_v44 = vld [vmem:[%s4253_s12 + $0x10] sm:$0xff] }
 0x5bb   :  { %v840_v45 = vpop.f32.mrf.mxu1 }
 0x5bc   :  { %1025 = vrot.lane.b32.xlu0 %v840_v45, %s3553_s22  ;;  %v1303_v45 = vld [vmem:[%s4253_s12 + $0x8] sm:$0xff] }
 0x5be   :  { %v3265_v47 = vpop.f32.mrf.mxu0 }
 0x5bf   :  { %1035 = vrot.lane.b32.xlu1 %v3265_v47, %s4268_s23  ;;  %v1302_v47 = vld [vmem:[%s4253_s12] sm:$0xff] }
 0x5c0   :  { %v927_v48 = vpop.f32.mrf.mxu0 }
 0x5c1   :  { %1033 = vrot.lane.b32.xlu0 %v927_v48, %s4268_s23  ;;  %v2996_v48 = vld [vmem:[%s4254_s11] ss:$0 sm:$0xff] }
 0x5c2   :  { %v3272_v49 = vpop.f32.mrf.mxu1 }
 0x5c3   :  { %1043 = vrot.lane.b32.xlu1 %v3272_v49, %s4266_s24 }
 0x5c4   :  { %v1014_v50 = vpop.f32.mrf.mxu1 }
 0x5c5   :  { %1041 = vrot.lane.b32.xlu0 %v1014_v50, %s4266_s24 }
 0x62c   :  { %v1028_v51 = vpop.permute.xlu1 %1027 }
 0x62d   :  { %v1048_v59 = vsel %vm225_vm1, %v3251_v38, %v1028_v51  ;;  %v1309_v38 = vld [vmem:[%s4253_s12 + $0x38] sm:$0xff] }
 0x62e   :  { %v1026_v52 = vpop.permute.xlu0 %1025  ;;  %3295 = vmatprep.subr.mxu0 %v1309_v38 }
 0x62f   :  { %v1047_v56 = vsel %vm225_vm1, %v753_v42, %v1026_v52  ;;  %v1306_v42 = vld [vmem:[%s4253_s12 + $0x20] sm:$0xff] }
 0x631   :  { %v1036_v53 = vpop.permute.xlu1 %1035 }
 0x632   :  { %v1050_v62 = vsel %vm586_vm2, %v1048_v59, %v1036_v53 }
 0x633   :  { %v1034_v55 = vpop.permute.xlu0 %1033 }
 0x634   :  { %v1049_v60 = vsel %vm586_vm2, %v1047_v56, %v1034_v55 }
 0x635   :  { %v1044_v58 = vpop.permute.xlu1 %1043 }
 0x636   :  { %v1053_v0 = vsel %vm1051_vm3, %v1050_v62, %v1044_v58 }
 0x637   :  { %v1042_v61 = vpop.permute.xlu0 %1041 }
 0x638   :  { %v1052_v63 = vsel %vm1051_vm3, %v1049_v60, %v1042_v61 }
 0x639   :  { %3281 = vmatprep.mubr.msk.f32.mxu0 %vm69_vm0, %v1052_v63 }
 0x63a   :  { %3282 = vmatmul.mubr.msk.f32.vlgmr.msra.gmra.mxu0 %vm69_vm0, %v1053_v0 }
 0x63b   :  { %3296 = vmatpush3.msra.mxu0 %v1309_v38 }
 0x63c   :  { %3297 = vmatprep.subr.mxu0 %v1308_v39 }
 0x63d   :  { %3298 = vmatpush3.msra.mxu0 %v1308_v39 }
 0x63e   :  { %3299 = vmatprep.subr.mxu0 %v1307_v40 }
 0x63f   :  { %3300 = vmatpush3.msra.mxu0 %v1307_v40 }
 0x640   :  { %3301 = vmatprep.subr.mxu0 %v1306_v42 }
 0x641   :  { %3302 = vmatpush3.msra.mxu0 %v1306_v42 }
 0x642   :  { %3303 = vmatprep.subr.mxu0 %v1305_v43 }
 0x643   :  { %3304 = vmatpush3.msra.mxu0 %v1305_v43  ;;  %v3003_v43 = vld [vmem:[%s4257_s15] ss:$0 sm:$0xff] }
 0x644   :  { %3305 = vmatprep.subr.mxu0 %v1304_v44 }
 0x645   :  { %3306 = vmatpush3.msra.mxu0 %v1304_v44 }
 0x646   :  { %3307 = vmatprep.subr.mxu0 %v1303_v45 }
 0x647   :  { %3308 = vmatpush3.msra.mxu0 %v1303_v45 }
 0x648   :  { %3309 = vmatprep.subr.mxu0 %v1302_v47 }
 0x649   :  { %3310 = vmatpush3.msra.mxu0 %v1302_v47 }
 0x6fa   :  { %v3283_v2 = vpop.f32.mrf.mxu0 }
 0x6fb   :  { %v1143_v3 = vadd.f32 %v3283_v2, %v2991_v1 }
 0x6fc   :  { %v1137_v4 = vpop.f32.mrf.mxu0 }
 0x6fd   :  { %v1138_v5 = vadd.f32 %v2991_v1, %v1137_v4  ;;  %v1147_v6 = vadd.f32 %v1143_v3, %v3695_v33 }
 0x6ff   :  { %v1153_v7 = vsel %vm69_vm0, %v1147_v6, 0.0  ;;  %v1146_v8 = vadd.f32 %v1138_v5, %v3691_v31  ;;  %v1195_v31 = vld [vmem:[%s4250_s10 + $0x18] sm:$0xff] }
 0x700   :  { %1154 = vadd.xlane.f32.xlu1 %v1153_v7  ;;  %3284 = vmatprep.subr.mxu1 %v1195_v31 }
 0x701   :  { %v1150_v9 = vsel %vm69_vm0, %v1146_v8, 0.0  ;;  %3285 = vmatpush3.msra.mxu1 %v1195_v31 }
 0x702   :  { %1151 = vadd.xlane.f32.xlu0 %v1150_v9  ;;  %3286 = vmatprep.subr.mxu1 %v1194_v17  ;;  %v2999_v9 = vld [vmem:[%s4255_s13] ss:$0 sm:$0xff] }
 0x703   :  { %3287 = vmatpush3.msra.mxu1 %v1194_v17 }
 0x704   :  { %3288 = vmatprep.subr.mxu1 %v1193_v18 }
 0x705   :  { %3289 = vmatpush3.msra.mxu1 %v1193_v18 }
 0x706   :  { %3290 = vmatprep.subr.mxu1 %v1192_v19 }
 0x707   :  { %3291 = vmatpush3.msra.mxu1 %v1192_v19 }
 0x789   :  { %v1155_v10 = vpop.xlane.xlu1 %1154 }
 0x78a   :  { %v1157_v11 = vmul.f32 0.03125, %v1155_v10 }
 0x78b   :  { %v1152_v12 = vpop.xlane.xlu0 %1151 }
 0x78c   :  { %v1156_v13 = vmul.f32 0.03125, %v1152_v12  ;;  %v1159_v14 = vsub.f32 %v1147_v6, %v1157_v11 }
 0x78e   :  { %v1158_v15 = vsub.f32 %v1146_v8, %v1156_v13  ;;  %v1161_v46 = vmul.f32 %v1159_v14, %v1159_v14 }
 0x790   :  { %v1160_v16 = vmul.f32 %v1158_v15, %v1158_v15  ;;  %v1165_v33 = vsel %vm69_vm0, %v1161_v46, 0.0 }
 0x792   :  { %v1162_v41 = vsel %vm69_vm0, %v1160_v16, 0.0 }
 0x793   :  { %1163 = vadd.xlane.f32.xlu0 %v1162_v41 }
 0x797   :  { %1166 = vadd.xlane.f32.xlu0 %v1165_v33 }
 0x81c   :  { %v1164_v20 = vpop.xlane.xlu0 %1163 }
 0x81d   :  { %v1168_v21 = vmul.f32 0.03125, %v1164_v20 }
 0x81f   :  { %v1170_v22 = vadd.f32 1e-05, %v1168_v21 }
 0x820   :  { %v1167_v23 = vpop.xlane.xlu0 %1166 }
 0x821   :  { %3490 = vrsqrt.f32 %v1170_v22  ;;  %v1169_v24 = vmul.f32 0.03125, %v1167_v23 }
 0x823   :  { %v1171_v25 = vadd.f32 1e-05, %v1169_v24  ;;  %v3007_v24 = vld [vmem:[%s4276_s26 + $0x38] sm:$0xff] }
 0x824   :  { %3314 = vmatprep.subr.mxu1 %v3007_v24 }
 0x825   :  { %3492 = vrsqrt.f32 %v1171_v25  ;;  %v3006_v25 = vld [vmem:[%s4276_s26 + $0x30] sm:$0xff] }
 0x82e   :  { %v3491_v26 = vpop.eup %3490 }
 0x82f   :  { %v1174_v28 = vmul.f32 %v3491_v26, %v1158_v15  ;;  %v3005_v26 = vld [vmem:[%s4276_s26 + $0x28] sm:$0xff] }
 0x831   :  { %v1182_v30 = vmul.f32 %v2994_v27, %v1174_v28 }
 0x832   :  { %v3493_v32 = vpop.eup %3492 }
 0x833   :  { %v1175_v34 = vmul.f32 %v3493_v32, %v1159_v14  ;;  %v3901_v35 = vadd.f32 %v2995_v29, %v1182_v30 }
 0x835   :  { %v1183_v36 = vmul.f32 %v2994_v27, %v1175_v34  ;;  %3292 = vmatprep.mubr.msk.f32.mxu1 %vm69_vm0, %v3901_v35  ;;  %v3004_v27 = vld [vmem:[%s4276_s26 + $0x20] sm:$0xff] }
 0x837   :  { %v1191_v37 = vadd.f32 %v2995_v29, %v1183_v36 }
 0x839   :  { %3293 = vmatmul.mubr.msk.f32.vlgmr.msra.gmra.mxu1 %vm69_vm0, %v1191_v37 }
 0x83a   :  { %3315 = vmatpush3.msra.mxu1 %v3007_v24 }
 0x83b   :  { %3316 = vmatprep.subr.mxu1 %v3006_v25 }
 0x83c   :  { %3317 = vmatpush3.msra.mxu1 %v3006_v25 }
 0x83d   :  { %3318 = vmatprep.subr.mxu1 %v3005_v26 }
 0x83e   :  { %3319 = vmatpush3.msra.mxu1 %v3005_v26 }
 0x83f   :  { %3320 = vmatprep.subr.mxu1 %v3004_v27 }
 0x840   :  { %3321 = vmatpush3.msra.mxu1 %v3004_v27 }
 0x8f9   :  { %v3294_v49 = vpop.f32.mrf.mxu1 }
 0x8fa   :  { %v1281_v50 = vadd.f32 %v3294_v49, %v2996_v48 }
 0x8fb   :  { %v1275_v51 = vpop.f32.mrf.mxu1 }
 0x8fc   :  { %v1287_v52 = vmul.f32 0.044715, %v1281_v50  ;;  %v1276_v53 = vadd.f32 %v2996_v48, %v1275_v51  ;;  %v1285_v6 = vmul.f32 0.5, %v1281_v50  ;;  %v3009_v48 = vld [vmem:[%s4279_s27 + $0x1] ss:$0 sm:$0xff] }
 0x8fe   :  { %v1289_v55 = vmul.f32 %v1287_v52, %v1281_v50  ;;  %v1286_v56 = vmul.f32 0.044715, %v1276_v53  ;;  %v1284_v4 = vmul.f32 0.5, %v1276_v53 }
 0x900   :  { %v1291_v58 = vmul.f32 %v1289_v55, %v1281_v50  ;;  %v1288_v59 = vmul.f32 %v1286_v56, %v1276_v53 }
 0x902   :  { %v1293_v60 = vadd.f32 %v1291_v58, %v1281_v50  ;;  %v1290_v61 = vmul.f32 %v1288_v59, %v1276_v53 }
 0x904   :  { %v1295_v62 = vmul.f32 0.7978846, %v1293_v60  ;;  %v1292_v63 = vadd.f32 %v1290_v61, %v1276_v53 }
 0x906   :  { %3494 = vtanh.f32 %v1295_v62  ;;  %v1294_v0 = vmul.f32 0.7978846, %v1292_v63 }
 0x908   :  { %3496 = vtanh.f32 %v1294_v0 }
 0x913   :  { %v3495_v1 = vpop.eup %3494 }
 0x914   :  { %v1299_v3 = vadd.f32 1.0, %v3495_v1 }
 0x915   :  { %v3497_v2 = vpop.eup %3496 }
 0x916   :  { %v1298_v5 = vadd.f32 1.0, %v3497_v2  ;;  %v1301_v8 = vmul.f32 %v1299_v3, %v1285_v6 }
 0x918   :  { %v1300_v7 = vmul.f32 %v1298_v5, %v1284_v4 }
 0x91a   :  { %3311 = vmatprep.mubr.msk.f32.mxu0 %vm1317_vm4, %v1300_v7 }
 0x91b   :  { %3312 = vmatmul.mubr.msk.f32.vlgmr.msra.gmra.mxu0 %vm1317_vm4, %v1301_v8 }
 0x9db   :  { %v3313_v10 = vpop.f32.mrf.mxu0 }
 0x9dc   :  { %v1396_v11 = vadd.f32 %v3313_v10, %v2999_v9 }
 0x9dd   :  { %v1390_v12 = vpop.f32.mrf.mxu0 }
 0x9de   :  { %v1391_v13 = vadd.f32 %v2999_v9, %v1390_v12  ;;  %v1400_v14 = vadd.f32 %v1396_v11, %v1191_v37  ;;  %v3002_v37 = vld [vmem:[%s4256_s14] ss:$0 sm:$0xff] }
 0x9e0   :  { %v1406_v15 = vsel %vm69_vm0, %v1400_v14, 0.0  ;;  %v1399_v16 = vadd.f32 %v1391_v13, %v3901_v35 }
 0x9e1   :  { %1407 = vadd.xlane.f32.xlu1 %v1406_v15 }
 0x9e2   :  { %v1403_v41 = vsel %vm69_vm0, %v1399_v16, 0.0 }
 0x9e3   :  { %1404 = vadd.xlane.f32.xlu0 %v1403_v41 }
 0xa6a   :  { %v1408_v46 = vpop.xlane.xlu1 %1407 }
 0xa6b   :  { %v1410_v33 = vmul.f32 0.03125, %v1408_v46 }
 0xa6c   :  { %v1405_v31 = vpop.xlane.xlu0 %1404 }
 0xa6d   :  { %v1412_v17 = vsub.f32 %v1400_v14, %v1410_v33  ;;  %v1409_v18 = vmul.f32 0.03125, %v1405_v31 }
 0xa6f   :  { %v1411_v19 = vsub.f32 %v1399_v16, %v1409_v18  ;;  %v1414_v20 = vmul.f32 %v1412_v17, %v1412_v17 }
 0xa71   :  { %v1418_v21 = vsel %vm69_vm0, %v1414_v20, 0.0  ;;  %v1413_v22 = vmul.f32 %v1411_v19, %v1411_v19 }
 0xa72   :  { %1419 = vadd.xlane.f32.xlu1 %v1418_v21 }
 0xa73   :  { %v1415_v23 = vsel %vm69_vm0, %v1413_v22, 0.0 }
 0xa74   :  { %1416 = vadd.xlane.f32.xlu0 %v1415_v23 }
 0xafb   :  { %v1420_v28 = vpop.xlane.xlu1 %1419 }
 0xafc   :  { %v1422_v29 = vmul.f32 0.03125, %v1420_v28 }
 0xafd   :  { %v1417_v30 = vpop.xlane.xlu0 %1416 }
 0xafe   :  { %v1424_v32 = vadd.f32 1e-05, %v1422_v29  ;;  %v1421_v34 = vmul.f32 0.03125, %v1417_v30 }
 0xb00   :  { %3498 = vrsqrt.f32 %v1424_v32  ;;  %v1423_v35 = vadd.f32 1e-05, %v1421_v34 }
 0xb02   :  { %3500 = vrsqrt.f32 %v1423_v35 }
 0xb0d   :  { %v3499_v36 = vpop.eup %3498 }
 0xb0e   :  { %v1428_v38 = vmul.f32 %v3499_v36, %v1412_v17 }
 0xb0f   :  { %v3501_v39 = vpop.eup %3500 }
 0xb10   :  { %v1427_v40 = vmul.f32 %v3501_v39, %v1411_v19  ;;  %v1436_v42 = vmul.f32 %v3002_v37, %v1428_v38 }
 0xb12   :  { %v1435_v44 = vmul.f32 %v3002_v37, %v1427_v40  ;;  %v3963_v47 = vadd.f32 %v3003_v43, %v1436_v42 }
 0xb14   :  { %v3961_v45 = vadd.f32 %v3003_v43, %v1435_v44 }
 0xb16   :  { %3322 = vmatprep.mubr.msk.f32.mxu1 %vm69_vm0, %v3961_v45 }
 0xb17   :  { %3323 = vmatmul.mubr.msk.f32.vlgmr.msra.gmra.mxu1 %vm69_vm0, %v3963_v47 }
 0xbd7   :  { %v3324_v49 = vpop.f32.mrf.mxu1 }
 0xbd8   :  { %v3972_v50 = vadd.f32 %v3324_v49, %v3009_v48 }
 0xbd9   :  { %v1530_v51 = vpop.f32.mrf.mxu1 }
 0xbda   :  { %v3974_v52 = vadd.f32 %v3009_v48, %v1530_v51  ;;  %1547 = vrot.lane.b32.xlu1 %v3972_v50, %s3548_s28  ;;  %1543 = vrot.lane.b32.xlu0 %v3972_v50, %s3549_s5 }
 0xbdc   :  { %3329 = vmatprep.mubr.msk.f32.mxu1 %vm225_vm1, %v3974_v52 }
 0xbde   :  { %1545 = vrot.lane.b32.xlu0 %v3974_v52, %s3548_s28  ;;  %1541 = vrot.lane.b32.xlu1 %v3974_v52, %s3549_s5 }
 0xbe2   :  { %1555 = vrot.lane.b32.xlu0 %v3972_v50, %s3550_s29  ;;  %1551 = vrot.lane.b32.xlu1 %v3972_v50, %s3551_s30 }
 0xbe6   :  { %1553 = vrot.lane.b32.xlu0 %v3974_v52, %s3550_s29  ;;  %1549 = vrot.lane.b32.xlu1 %v3974_v52, %s3551_s30 }
 0xc4c   :  { %v3994_v53 = vpop.permute.xlu1 %1547  ;;  %v3996_v55 = vpop.permute.xlu0 %1543 }
 0xc4d   :  { %1729 = vrot.lane.b32.xlu0 %v3994_v53, %s3550_s29  ;;  %1642 = vrot.lane.b32.xlu1 %v3996_v55, %s3550_s29 }
 0xc50   :  { %v4002_v56 = vpop.permute.xlu0 %1545  ;;  %v4004_v58 = vpop.permute.xlu1 %1541 }
 0xc51   :  { %1727 = vrot.lane.b32.xlu0 %v4002_v56, %s3550_s29  ;;  %3336 = vmatprep.mubr.msk.f32.mxu0 %vm225_vm1, %v4004_v58 }
 0xc52   :  { %1640 = vrot.lane.b32.xlu1 %v4004_v58, %s3550_s29 }
 0xc54   :  { %v1556_v59 = vpop.permute.xlu0 %1555  ;;  %v4012_v60 = vpop.permute.xlu1 %1551 }
 0xc55   :  { %3325 = vmatprep.subr.msk.mxu1 %vm225_vm1, %v1556_v59 }
 0xc56   :  { %1816 = vrot.lane.b32.xlu1 %v4012_v60, %s3550_s29  ;;  %3326 = vmatpush3.xpose.msk.msra.mxu1 %vm225_vm1, %v1556_v59 }
 0xc58   :  { %v1554_v61 = vpop.permute.xlu0 %1553  ;;  %v4018_v62 = vpop.permute.xlu1 %1549 }
 0xc59   :  { %3327 = vmatprep.subr.msk.mxu1 %vm225_vm1, %v1554_v61 }
 0xc5a   :  { %1814 = vrot.lane.b32.xlu1 %v4018_v62, %s3550_s29  ;;  %3328 = vmatpush3.xpose.msk.msra.mxu1 %vm225_vm1, %v1554_v61 }
 0xc5d   :  { %3330 = vmatmul.mubr.msk.f32.vlgmr.msra.gmra.mxu1 %vm225_vm1, %v3972_v50 }
 0xc5e   :  { %3343 = vmatprep.mubr.msk.f32.mxu1 %vm225_vm1, %v4002_v56 }
 0xcbf   :  { %v1730_v63 = vpop.permute.xlu0 %1729  ;;  %v1643_v0 = vpop.permute.xlu1 %1642 }
 0xcc0   :  { %3332 = vmatprep.subr.msk.mxu0 %vm225_vm1, %v1643_v0  ;;  %3339 = vmatprep.subr.msk.mxu1 %vm225_vm1, %v1730_v63 }
 0xcc1   :  { %3333 = vmatpush3.xpose.msk.msra.mxu0 %vm225_vm1, %v1643_v0  ;;  %3340 = vmatpush3.xpose.msk.msra.mxu1 %vm225_vm1, %v1730_v63 }
 0xcc3   :  { %v1728_v1 = vpop.permute.xlu0 %1727 }
 0xcc4   :  { %v1641_v2 = vpop.permute.xlu1 %1640  ;;  %3341 = vmatprep.subr.msk.mxu1 %vm225_vm1, %v1728_v1 }
 0xcc5   :  { %3334 = vmatprep.subr.msk.mxu0 %vm225_vm1, %v1641_v2  ;;  %3342 = vmatpush3.xpose.msk.msra.mxu1 %vm225_vm1, %v1728_v1 }
 0xcc6   :  { %3335 = vmatpush3.xpose.msk.msra.mxu0 %vm225_vm1, %v1641_v2 }
 0xcc8   :  { %v1817_v3 = vpop.permute.xlu1 %1816  ;;  %3344 = vmatmul.mubr.msk.f32.vlgmr.msra.gmra.mxu1 %vm225_vm1, %v3994_v53 }
 0xcc9   :  { %3337 = vmatmul.mubr.msk.f32.vlgmr.msra.gmra.mxu0 %vm225_vm1, %v3996_v55  ;;  %3346 = vmatprep.subr.msk.mxu0 %vm225_vm1, %v1817_v3 }
 0xcca   :  { %3347 = vmatpush3.xpose.msk.msra.mxu0 %vm225_vm1, %v1817_v3  ;;  %3350 = vmatprep.mubr.msk.f32.mxu0 %vm225_vm1, %v4018_v62 }
 0xccc   :  { %v1815_v4 = vpop.permute.xlu1 %1814 }
 0xccd   :  { %3348 = vmatprep.subr.msk.mxu0 %vm225_vm1, %v1815_v4 }
 0xcce   :  { %3349 = vmatpush3.xpose.msk.msra.mxu0 %vm225_vm1, %v1815_v4 }
 0xcd1   :  { %3351 = vmatmul.mubr.msk.f32.vlgmr.msra.gmra.mxu0 %vm225_vm1, %v4012_v60 }
 0xd1d   :  { %v3331_v5 = vpop.f32.mrf.mxu1 }
 0xd1e   :  { %v1902_v6 = vmul.f32 0.35355338, %v3331_v5 }
 0xd1f   :  { %v1631_v7 = vpop.f32.mrf.mxu1 }
 0xd20   :  { %v1901_v8 = vmul.f32 0.35355338, %v1631_v7  ;;  %v1910_v9 = vadd.f32 %v1902_v6, %v3781_v54 }
 0xd22   :  { %v1920_v10 = vsel %vm586_vm2, %v1910_v9, -inf  ;;  %v1909_v11 = vadd.f32 %v1901_v8, %v3786_v57 }
 0xd23   :  { %1921 = vmax.xlane.f32.xlu1 %v1920_v10 }
 0xd24   :  { %v1917_v12 = vsel %vm586_vm2, %v1909_v11, -inf }
 0xd25   :  { %1918 = vmax.xlane.f32.xlu0 %v1917_v12 }
 0xd88   :  { %v3345_v13 = vpop.f32.mrf.mxu1 }
 0xd89   :  { %v3338_v14 = vpop.f32.mrf.mxu0  ;;  %v1906_v15 = vmul.f32 0.35355338, %v3345_v13 }
 0xd8a   :  { %v1904_v16 = vmul.f32 0.35355338, %v3338_v14  ;;  %v1805_v46 = vpop.f32.mrf.mxu1 }
 0xd8b   :  { %v1718_v41 = vpop.f32.mrf.mxu0  ;;  %v1914_v33 = vadd.f32 %v1906_v15, %v3781_v54  ;;  %v1905_v19 = vmul.f32 0.35355338, %v1805_v46 }
 0xd8c   :  { %v1903_v31 = vmul.f32 0.35355338, %v1718_v41  ;;  %v1912_v17 = vadd.f32 %v1904_v16, %v3781_v54 }
 0xd8d   :  { %v1932_v18 = vsel %vm586_vm2, %v1914_v33, -inf  ;;  %v1913_v25 = vadd.f32 %v1905_v19, %v3786_v57 }
 0xd8e   :  { %v1926_v20 = vsel %vm586_vm2, %v1912_v17, -inf  ;;  %1933 = vmax.xlane.f32.xlu1 %v1932_v18  ;;  %v1911_v21 = vadd.f32 %v1903_v31, %v3786_v57 }
 0xd8f   :  { %1927 = vmax.xlane.f32.xlu0 %v1926_v20  ;;  %v1929_v30 = vsel %vm586_vm2, %v1913_v25, -inf }
 0xd90   :  { %v1923_v24 = vsel %vm586_vm2, %v1911_v21, -inf }
 0xd91   :  { %v3352_v22 = vpop.f32.mrf.mxu0 }
 0xd92   :  { %v1908_v23 = vmul.f32 0.35355338, %v3352_v22 }
 0xd93   :  { %v1892_v26 = vpop.f32.mrf.mxu0  ;;  %1924 = vmax.xlane.f32.xlu0 %v1923_v24 }
 0xd94   :  { %v1907_v27 = vmul.f32 0.35355338, %v1892_v26  ;;  %v1916_v28 = vadd.f32 %v1908_v23, %v3781_v54 }
 0xd96   :  { %v1938_v29 = vsel %vm586_vm2, %v1916_v28, -inf  ;;  %v1915_v32 = vadd.f32 %v1907_v27, %v3786_v57 }
 0xd97   :  { %1939 = vmax.xlane.f32.xlu1 %v1938_v29  ;;  %1930 = vmax.xlane.f32.xlu0 %v1929_v30 }
 0xd98   :  { %v1935_v34 = vsel %vm586_vm2, %v1915_v32, -inf }
 0xd9b   :  { %1936 = vmax.xlane.f32.xlu0 %v1935_v34 }
 0xda8   :  { %2005 = vrot.lane.b32.xlu1 %v3974_v52, %s3552_s1 }
 0xdac   :  { %2094 = vrot.lane.b32.xlu1 %v3996_v55, %s3552_s1  ;;  %v1922_v35 = vpop.xlane.xlu1 %1921 }
 0xdad   :  { %v1942_v36 = vsub.f32 %v1910_v9, %v1922_v35 }
 0xdae   :  { %v1919_v54 = vpop.xlane.xlu0 %1918 }
 0xdaf   :  { %v1941_v57 = vsub.f32 %v1909_v11, %v1919_v54  ;;  %v1951_v38 = vmul.f32 1.442695, %v1942_v36 }
 0xdb0   :  { %2092 = vrot.lane.b32.xlu1 %v4004_v58, %s3552_s1 }
 0xdb1   :  { %2007 = vrot.lane.b32.xlu0 %v3972_v50, %s3552_s1  ;;  %v1949_v37 = vmul.f32 1.442695, %v1941_v57 }
 0xdb3   :  { %3502 = vpow2.f32 %v1949_v37 }
 0xdb4   :  { %2268 = vrot.lane.b32.xlu1 %v4012_v60, %s3552_s1  ;;  %3504 = vpow2.f32 %v1951_v38 }
 0xdb5   :  { %2181 = vrot.lane.b32.xlu0 %v3994_v53, %s3552_s1 }
 0xdc0   :  { %v4076_v39 = vpop.eup %3502 }
 0xdc1   :  { %v1965_v40 = vsel %vm586_vm2, %v4076_v39, 0.0  ;;  %v4080_v42 = vpop.eup %3504 }
 0xdc2   :  { %v1968_v43 = vsel %vm586_vm2, %v4080_v42, 0.0 }
 0xdd4   :  { %1966 = vadd.xlane.f32.xlu0 %v1965_v40 }
 0xdd8   :  { %1969 = vadd.xlane.f32.xlu1 %v1968_v43 }
 0xe17   :  { %v1934_v44 = vpop.xlane.xlu1 %1933 }
 0xe18   :  { %v1928_v48 = vpop.xlane.xlu0 %1927  ;;  %v1946_v49 = vsub.f32 %v1914_v33, %v1934_v44  ;;  %v3039_v44 = vld [vmem:[%s4248_s6 + $0x38] sm:$0xff] }
 0xe19   :  { %v1944_v50 = vsub.f32 %v1912_v17, %v1928_v48 }
 0xe1a   :  { %v1959_v52 = vmul.f32 1.442695, %v1946_v49  ;;  %v3038_v49 = vld [vmem:[%s4248_s6 + $0x30] sm:$0xff] }
 0xe1b   :  { %v1955_v51 = vmul.f32 1.442695, %v1944_v50  ;;  %v3037_v50 = vld [vmem:[%s4248_s6 + $0x28] sm:$0xff] }
 0xe1c   :  { %v1925_v53 = vpop.xlane.xlu0 %1924 }
 0xe1d   :  { %3506 = vpow2.f32 %v1955_v51  ;;  %v1943_v55 = vsub.f32 %v1911_v21, %v1925_v53 }
 0xe1e   :  { %3508 = vpow2.f32 %v1959_v52  ;;  %v3036_v52 = vld [vmem:[%s4248_s6 + $0x20] sm:$0xff] }
 0xe1f   :  { %v1953_v58 = vmul.f32 1.442695, %v1943_v55 }
 0xe20   :  { %v1940_v59 = vpop.xlane.xlu1 %1939  ;;  %v1931_v60 = vpop.xlane.xlu0 %1930 }
 0xe21   :  { %3510 = vpow2.f32 %v1953_v58  ;;  %v1948_v61 = vsub.f32 %v1916_v28, %v1940_v59  ;;  %v1945_v63 = vsub.f32 %v1913_v25, %v1931_v60 }
 0xe23   :  { %v1963_v0 = vmul.f32 1.442695, %v1948_v61  ;;  %v1957_v1 = vmul.f32 1.442695, %v1945_v63 }
 0xe24   :  { %v1937_v2 = vpop.xlane.xlu0 %1936  ;;  %v2006_v4 = vpop.permute.xlu1 %2005 }
 0xe25   :  { %3512 = vpow2.f32 %v1963_v0  ;;  %v1947_v3 = vsub.f32 %v1915_v32, %v1937_v2 }
 0xe26   :  { %3514 = vpow2.f32 %v1957_v1 }
 0xe27   :  { %v1961_v5 = vmul.f32 1.442695, %v1947_v3 }
 0xe28   :  { %v2008_v6 = vpop.permute.xlu0 %2007  ;;  %v2095_v10 = vpop.permute.xlu1 %2094 }
 0xe29   :  { %3516 = vpow2.f32 %v1961_v5  ;;  %3353 = vmatprep.subr.mxu1 %v2008_v6 }
 0xe2a   :  { %v3507_v7 = vpop.eup %3506  ;;  %3354 = vmatpush3.msra.mxu1 %v2008_v6 }
 0xe2b   :  { %3355 = vmatprep.subr.mxu1 %v2006_v4  ;;  %v1974_v8 = vsel %vm586_vm2, %v3507_v7, 0.0  ;;  %v4085_v9 = vpop.eup %3508 }
 0xe2c   :  { %1975 = vadd.xlane.f32.xlu1 %v1974_v8  ;;  %3356 = vmatpush3.msra.mxu1 %v2006_v4  ;;  %v2182_v11 = vpop.permute.xlu0 %2181  ;;  %v1980_v13 = vsel %vm586_vm2, %v4085_v9, 0.0  ;;  %v2093_v17 = vpop.permute.xlu1 %2092 }
 0xe2d   :  { %3360 = vmatprep.subr.mxu1 %v2095_v10  ;;  %3367 = vmatprep.subr.mxu0 %v2182_v11 }
 0xe2e   :  { %v3511_v12 = vpop.eup %3510  ;;  %3368 = vmatpush3.msra.mxu0 %v2182_v11  ;;  %v3041_v11 = vld [vmem:[%s4249_s7 + $0x1] ss:$0 sm:$0xff] }
 0xe2f   :  { %v1971_v14 = vsel %vm586_vm2, %v3511_v12, 0.0 }
 0xe30   :  { %1981 = vadd.xlane.f32.xlu1 %v1980_v13  ;;  %1972 = vadd.xlane.f32.xlu0 %v1971_v14  ;;  %v2269_v18 = vpop.permute.xlu1 %2268 }
 0xe32   :  { %v3513_v15 = vpop.eup %3512 }
 0xe33   :  { %v3515_v16 = vpop.eup %3514  ;;  %v1986_v41 = vsel %vm586_vm2, %v3513_v15, 0.0 }
 0xe34   :  { %1987 = vadd.xlane.f32.xlu1 %v1986_v41  ;;  %v1977_v46 = vsel %vm586_vm2, %v3515_v16, 0.0 }
 0xe35   :  { %1978 = vadd.xlane.f32.xlu0 %v1977_v46 }
 0xe36   :  { %v3517_v33 = vpop.eup %3516 }
 0xe37   :  { %v1983_v31 = vsel %vm586_vm2, %v3517_v33, 0.0 }
 0xe39   :  { %1984 = vadd.xlane.f32.xlu0 %v1983_v31 }
 0xe45   :  { %2266 = vrot.lane.b32.xlu1 %v4018_v62, %s3552_s1 }
 0xe4f   :  { %2179 = vrot.lane.b32.xlu0 %v4002_v56, %s3552_s1 }
 0xe5d   :  { %v1967_v19 = vpop.xlane.xlu0 %1966 }
 0xe5e   :  { %3518 = vrcp.f32 %v1967_v19 }
 0xe61   :  { %v1970_v20 = vpop.xlane.xlu1 %1969 }
 0xe62   :  { %3520 = vrcp.f32 %v1970_v20 }
 0xe6b   :  { %v3519_v21 = vpop.eup %3518 }
 0xe6c   :  { %v1997_v22 = vmul.f32 %v3519_v21, %v4076_v39 }
 0xe6e   :  { %3357 = vmatprep.mubr.msk.f32.mxu1 %vm586_vm2, %v1997_v22 }
 0xe6f   :  { %v3521_v23 = vpop.eup %3520 }
 0xe70   :  { %v1998_v24 = vmul.f32 %v3521_v23, %v4080_v42 }
 0xe72   :  { %3358 = vmatmul.mubr.msk.f32.vlgmr.msra.gmra.mxu1 %vm586_vm2, %v1998_v24 }
 0xe73   :  { %3361 = vmatpush3.msra.mxu1 %v2095_v10 }
 0xe74   :  { %3362 = vmatprep.subr.mxu1 %v2093_v17 }
 0xe75   :  { %3363 = vmatpush3.msra.mxu1 %v2093_v17 }
 0xe76   :  { %3374 = vmatprep.subr.mxu1 %v2269_v18 }
 0xeb5   :  { %v1976_v56 = vpop.xlane.xlu1 %1975 }
 0xeb6   :  { %3522 = vrcp.f32 %v1976_v56  ;;  %v3050_v56 = vld [vmem:[%s4250_s10 + $0x30] sm:$0xff] }
 0xeb9   :  { %v1982_v62 = vpop.xlane.xlu1 %1981  ;;  %v1973_v25 = vpop.xlane.xlu0 %1972 }
 0xeba   :  { %3524 = vrcp.f32 %v1973_v25  ;;  %v3048_v25 = vld [vmem:[%s4250_s10 + $0x20] sm:$0xff] }
 0xebb   :  { %3526 = vrcp.f32 %v1982_v62  ;;  %v3049_v62 = vld [vmem:[%s4250_s10 + $0x28] sm:$0xff] }
 0xebd   :  { %v1988_v27 = vpop.xlane.xlu1 %1987 }
 0xebe   :  { %v1979_v26 = vpop.xlane.xlu0 %1978 }
 0xebf   :  { %3528 = vrcp.f32 %v1979_v26 }
 0xec0   :  { %3530 = vrcp.f32 %v1988_v27 }
 0xec1   :  { %v2267_v36 = vpop.permute.xlu1 %2266 }
 0xec2   :  { %v1985_v28 = vpop.xlane.xlu0 %1984 }
 0xec3   :  { %3532 = vrcp.f32 %v1985_v28  ;;  %v3523_v30 = vpop.eup %3522 }
 0xec4   :  { %v2000_v54 = vmul.f32 %v3523_v30, %v3507_v7 }
 0xec6   :  { %v2180_v29 = vpop.permute.xlu0 %2179 }
 0xec7   :  { %3369 = vmatprep.subr.mxu0 %v2180_v29  ;;  %v3525_v32 = vpop.eup %3524 }
 0xec8   :  { %3370 = vmatpush3.msra.mxu0 %v2180_v29  ;;  %v1999_v34 = vmul.f32 %v3525_v32, %v3511_v12  ;;  %v3527_v57 = vpop.eup %3526 }
 0xec9   :  { %v2002_v38 = vmul.f32 %v3527_v57, %v4085_v9  ;;  %3381 = vmatprep.subr.mxu0 %v3039_v44 }
 0xeca   :  { %3364 = vmatprep.mubr.msk.f32.mxu1 %vm586_vm2, %v1999_v34 }
 0xecb   :  { %3365 = vmatmul.mubr.msk.f32.vlgmr.msra.gmra.mxu1 %vm586_vm2, %v2000_v54  ;;  %v3046_v54 = vld [vmem:[%s4251_s8 + $0x1] ss:$0 sm:$0xff] }
 0xecc   :  { %v3529_v35 = vpop.eup %3528  ;;  %3375 = vmatpush3.msra.mxu1 %v2269_v18 }
 0xecd   :  { %v2001_v37 = vmul.f32 %v3529_v35, %v3515_v16  ;;  %3376 = vmatprep.subr.mxu1 %v2267_v36  ;;  %v3531_v39 = vpop.eup %3530  ;;  %v3047_v35 = vld [vmem:[%s4252_s9 + $0x1] ss:$0 sm:$0xff] }
 0xece   :  { %3377 = vmatpush3.msra.mxu1 %v2267_v36  ;;  %v2004_v43 = vmul.f32 %v3531_v39, %v3513_v15 }
 0xecf   :  { %3371 = vmatprep.mubr.msk.f32.mxu0 %vm586_vm2, %v2001_v37 }
 0xed0   :  { %v3533_v40 = vpop.eup %3532  ;;  %3372 = vmatmul.mubr.msk.f32.vlgmr.msra.gmra.mxu0 %vm586_vm2, %v2002_v38 }
 0xed1   :  { %v2003_v42 = vmul.f32 %v3533_v40, %v3517_v33  ;;  %3382 = vmatpush3.msra.mxu0 %v3039_v44  ;;  %v3062_v44 = vld [vmem:[%s4253_s12 + $0x70] sm:$0xff] }
 0xed2   :  { %3383 = vmatprep.subr.mxu0 %v3038_v49 }
 0xed3   :  { %3378 = vmatprep.mubr.msk.f32.mxu1 %vm586_vm2, %v2003_v42  ;;  %3384 = vmatpush3.msra.mxu0 %v3038_v49  ;;  %v3060_v49 = vld [vmem:[%s4253_s12 + $0x60] sm:$0xff] }
 0xed4   :  { %3379 = vmatmul.mubr.msk.f32.vlgmr.msra.gmra.mxu1 %vm586_vm2, %v2004_v43  ;;  %3385 = vmatprep.subr.mxu0 %v3037_v50  ;;  %v3063_v43 = vld [vmem:[%s4253_s12 + $0x78] sm:$0xff] }
 0xed5   :  { %3386 = vmatpush3.msra.mxu0 %v3037_v50  ;;  %v3059_v50 = vld [vmem:[%s4253_s12 + $0x58] sm:$0xff] }
 0xed6   :  { %3387 = vmatprep.subr.mxu0 %v3036_v52 }
 0xed7   :  { %3388 = vmatpush3.msra.mxu0 %v3036_v52  ;;  %v3057_v52 = vld [vmem:[%s4253_s12 + $0x48] sm:$0xff] }
 0xed8   :  { %3403 = vmatprep.subr.mxu0 %v3063_v43 }
 0xf32   :  { %v3359_v48 = vpop.f32.mrf.mxu1 }
 0xf34   :  { %v2083_v51 = vpop.f32.mrf.mxu1 }
 0xf8b   :  { %v3366_v53 = vpop.f32.mrf.mxu1 }
 0xf8c   :  { %2357 = vrot.lane.b32.xlu1 %v3366_v53, %s3553_s22  ;;  %v3056_v53 = vld [vmem:[%s4253_s12 + $0x40] sm:$0xff] }
 0xf8d   :  { %v2170_v55 = vpop.f32.mrf.mxu1 }
 0xf8e   :  { %2355 = vrot.lane.b32.xlu0 %v2170_v55, %s3553_s22  ;;  %v3053_v55 = vld [vmem:[%s4254_s11 + $0x1] ss:$0 sm:$0xff] }
 0xf90   :  { %v3373_v58 = vpop.f32.mrf.mxu0 }
 0xf91   :  { %2365 = vrot.lane.b32.xlu1 %v3373_v58, %s4280_s25 }
 0xf92   :  { %v2257_v59 = vpop.f32.mrf.mxu0 }
 0xf93   :  { %2363 = vrot.lane.b32.xlu0 %v2257_v59, %s4280_s25 }
 0xf94   :  { %v3380_v60 = vpop.f32.mrf.mxu1 }
 0xf95   :  { %2373 = vrot.lane.b32.xlu1 %v3380_v60, %s4281_s3 }
 0xf96   :  { %v2344_v61 = vpop.f32.mrf.mxu1 }
 0xf97   :  { %2371 = vrot.lane.b32.xlu0 %v2344_v61, %s4281_s3 }
 0xffe   :  { %v2358_v63 = vpop.permute.xlu1 %2357 }
 0xfff   :  { %v2378_v5 = vsel %vm225_vm1, %v3359_v48, %v2358_v63  ;;  %v3061_v48 = vld [vmem:[%s4253_s12 + $0x68] sm:$0xff] }
0x1000   :  { %v2356_v0 = vpop.permute.xlu0 %2355 }
0x1001   :  { %v2377_v3 = vsel %vm225_vm1, %v2083_v51, %v2356_v0  ;;  %v3058_v51 = vld [vmem:[%s4253_s12 + $0x50] sm:$0xff] }
0x1003   :  { %v2366_v1 = vpop.permute.xlu1 %2365 }
0x1004   :  { %v2380_v8 = vsel %vm586_vm2, %v2378_v5, %v2366_v1 }
0x1005   :  { %v2364_v2 = vpop.permute.xlu0 %2363 }
0x1006   :  { %v2379_v6 = vsel %vm586_vm2, %v2377_v3, %v2364_v2 }
0x1007   :  { %v2374_v4 = vpop.permute.xlu1 %2373 }
0x1008   :  { %v2382_v10 = vsel %vm1051_vm3, %v2380_v8, %v2374_v4 }
0x1009   :  { %v2372_v7 = vpop.permute.xlu0 %2371 }
0x100a   :  { %v2381_v9 = vsel %vm1051_vm3, %v2379_v6, %v2372_v7 }
0x100b   :  { %3389 = vmatprep.mubr.msk.f32.mxu0 %vm69_vm0, %v2381_v9 }
0x100c   :  { %3390 = vmatmul.mubr.msk.f32.vlgmr.msra.gmra.mxu0 %vm69_vm0, %v2382_v10 }
0x100d   :  { %3404 = vmatpush3.msra.mxu0 %v3063_v43 }
0x100e   :  { %3405 = vmatprep.subr.mxu0 %v3062_v44 }
0x100f   :  { %3406 = vmatpush3.msra.mxu0 %v3062_v44  ;;  %v3071_v44 = vld [vmem:[%s4257_s15 + $0x1] ss:$0 sm:$0xff] }
0x1010   :  { %3407 = vmatprep.subr.mxu0 %v3061_v48 }
0x1011   :  { %3408 = vmatpush3.msra.mxu0 %v3061_v48 }
0x1012   :  { %3409 = vmatprep.subr.mxu0 %v3060_v49 }
0x1013   :  { %3410 = vmatpush3.msra.mxu0 %v3060_v49 }
0x1014   :  { %3411 = vmatprep.subr.mxu0 %v3059_v50 }
0x1015   :  { %3412 = vmatpush3.msra.mxu0 %v3059_v50 }
0x1016   :  { %3413 = vmatprep.subr.mxu0 %v3058_v51 }
0x1017   :  { %3414 = vmatpush3.msra.mxu0 %v3058_v51 }
0x1018   :  { %3415 = vmatprep.subr.mxu0 %v3057_v52 }
0x1019   :  { %3416 = vmatpush3.msra.mxu0 %v3057_v52 }
0x101a   :  { %3417 = vmatprep.subr.mxu0 %v3056_v53 }
0x101b   :  { %3418 = vmatpush3.msra.mxu0 %v3056_v53 }
0x10cc   :  { %v3391_v12 = vpop.f32.mrf.mxu0 }
0x10cd   :  { %v2474_v13 = vadd.f32 %v3391_v12, %v3041_v11 }
0x10ce   :  { %v2468_v14 = vpop.f32.mrf.mxu0 }
0x10cf   :  { %v2478_v15 = vadd.f32 %v2474_v13, %v3963_v47  ;;  %v2469_v16 = vadd.f32 %v3041_v11, %v2468_v14 }
0x10d1   :  { %v2477_v41 = vadd.f32 %v2469_v16, %v3961_v45  ;;  %v2486_v46 = vsel %vm69_vm0, %v2478_v15, 0.0  ;;  %v3051_v45 = vld [vmem:[%s4250_s10 + $0x38] sm:$0xff] }
0x10d2   :  { %2487 = vadd.xlane.f32.xlu1 %v2486_v46  ;;  %3392 = vmatprep.subr.mxu1 %v3051_v45 }
0x10d3   :  { %v2483_v33 = vsel %vm69_vm0, %v2477_v41, 0.0  ;;  %3393 = vmatpush3.msra.mxu1 %v3051_v45 }
0x10d4   :  { %2484 = vadd.xlane.f32.xlu0 %v2483_v33  ;;  %3394 = vmatprep.subr.mxu1 %v3050_v56 }
0x10d5   :  { %3395 = vmatpush3.msra.mxu1 %v3050_v56 }
0x10d6   :  { %3396 = vmatprep.subr.mxu1 %v3049_v62 }
0x10d7   :  { %3397 = vmatpush3.msra.mxu1 %v3049_v62 }
0x10d8   :  { %3398 = vmatprep.subr.mxu1 %v3048_v25 }
0x10d9   :  { %3399 = vmatpush3.msra.mxu1 %v3048_v25 }
0x115b   :  { %v2488_v31 = vpop.xlane.xlu1 %2487 }
0x115c   :  { %v2490_v17 = vmul.f32 0.03125, %v2488_v31 }
0x115d   :  { %v2485_v18 = vpop.xlane.xlu0 %2484 }
0x115e   :  { %v2489_v19 = vmul.f32 0.03125, %v2485_v18  ;;  %v2492_v20 = vsub.f32 %v2478_v15, %v2490_v17 }
0x1160   :  { %v2491_v21 = vsub.f32 %v2477_v41, %v2489_v19  ;;  %v2494_v24 = vmul.f32 %v2492_v20, %v2492_v20  ;;  %v3065_v41 = vld [vmem:[%s4255_s13 + $0x1] ss:$0 sm:$0xff] }
0x1162   :  { %v2493_v22 = vmul.f32 %v2491_v21, %v2491_v21  ;;  %v2498_v47 = vsel %vm69_vm0, %v2494_v24, 0.0 }
0x1164   :  { %v2495_v23 = vsel %vm69_vm0, %v2493_v22, 0.0 }
0x1165   :  { %2496 = vadd.xlane.f32.xlu0 %v2495_v23 }
0x1169   :  { %2499 = vadd.xlane.f32.xlu0 %v2498_v47 }
0x11ee   :  { %v2497_v26 = vpop.xlane.xlu0 %2496 }
0x11ef   :  { %v2501_v27 = vmul.f32 0.03125, %v2497_v26 }
0x11f1   :  { %v2503_v28 = vadd.f32 1e-05, %v2501_v27 }
0x11f2   :  { %v2500_v29 = vpop.xlane.xlu0 %2499 }
0x11f3   :  { %3534 = vrsqrt.f32 %v2503_v28  ;;  %v2502_v30 = vmul.f32 0.03125, %v2500_v29  ;;  %v3556_v28 = vmov 0.0   ;;  %v2791_v29 = vld [vmem:[%s4258_s16 + $0x18] sm:$0xff] }
0x11f4   :  { %3422 = vmatprep.subr.mxu1 %v3556_v28 }
0x11f5   :  { %v2504_v32 = vadd.f32 1e-05, %v2502_v30  ;;  %v2790_v30 = vld [vmem:[%s4258_s16 + $0x10] sm:$0xff] }
0x11f7   :  { %3536 = vrsqrt.f32 %v2504_v32  ;;  %v2789_v32 = vld [vmem:[%s4258_s16 + $0x8] sm:$0xff] }
0x1200   :  { %v3535_v34 = vpop.eup %3534 }
0x1201   :  { %v2507_v57 = vmul.f32 %v3535_v34, %v2491_v21  ;;  %v2788_v34 = vld [vmem:[%s4258_s16] sm:$0xff] }
0x1203   :  { %v2515_v36 = vmul.f32 %v3046_v54, %v2507_v57 }
0x1204   :  { %v3537_v37 = vpop.eup %3536 }
0x1205   :  { %v2508_v38 = vmul.f32 %v3537_v37, %v2492_v20  ;;  %v2523_v39 = vadd.f32 %v3047_v35, %v2515_v36 }
0x1207   :  { %v2516_v40 = vmul.f32 %v3046_v54, %v2508_v38  ;;  %3400 = vmatprep.mubr.msk.f32.mxu1 %vm69_vm0, %v2523_v39 }
0x1209   :  { %v2524_v42 = vadd.f32 %v3047_v35, %v2516_v40  ;;  %v3070_v40 = vld [vmem:[%s4256_s14 + $0x1] ss:$0 sm:$0xff] }
0x120b   :  { %3401 = vmatmul.mubr.msk.f32.vlgmr.msra.gmra.mxu1 %vm69_vm0, %v2524_v42 }
0x120c   :  { %3430 = vmatprep.mubr.msk.f32.mxu1 %vm3557_vm5, %v3556_v28  ;;  %3423 = vmatpush3.msra.mxu1 %v2791_v29 }
0x120d   :  { %3424 = vmatprep.subr.mxu1 %v3556_v28 }
0x120e   :  { %3425 = vmatpush3.msra.mxu1 %v2790_v30 }
0x120f   :  { %3426 = vmatprep.subr.mxu1 %v3556_v28 }
0x1210   :  { %3427 = vmatpush3.msra.mxu1 %v2789_v32 }
0x1211   :  { %3428 = vmatprep.subr.mxu1 %v3556_v28 }
0x1212   :  { %3429 = vmatpush3.msra.mxu1 %v2788_v34 }
0x1213   :  { %3433 = vmatprep.subr.mxu1 %v3556_v28 }
0x12cb   :  { %v3402_v58 = vpop.f32.mrf.mxu1 }
0x12cc   :  { %v2616_v59 = vadd.f32 %v3402_v58, %v3053_v55  ;;  %v2876_v58 = vld [vmem:[%s4259_s18 + $0x18] sm:$0xff] }
0x12cd   :  { %v2610_v60 = vpop.f32.mrf.mxu1 }
0x12ce   :  { %v2622_v61 = vmul.f32 0.044715, %v2616_v59  ;;  %v2611_v63 = vadd.f32 %v3053_v55, %v2610_v60  ;;  %v2620_v14 = vmul.f32 0.5, %v2616_v59  ;;  %v2874_v60 = vld [vmem:[%s4259_s18 + $0x8] sm:$0xff] }
0x12d0   :  { %v2624_v0 = vmul.f32 %v2622_v61, %v2616_v59  ;;  %v2621_v1 = vmul.f32 0.044715, %v2611_v63  ;;  %v2619_v12 = vmul.f32 0.5, %v2611_v63  ;;  %v2873_v61 = vld [vmem:[%s4259_s18] sm:$0xff] }
0x12d2   :  { %v2626_v2 = vmul.f32 %v2624_v0, %v2616_v59  ;;  %v2623_v3 = vmul.f32 %v2621_v1, %v2611_v63 }
0x12d4   :  { %v2628_v4 = vadd.f32 %v2626_v2, %v2616_v59  ;;  %v2625_v5 = vmul.f32 %v2623_v3, %v2611_v63  ;;  %v2875_v59 = vld [vmem:[%s4259_s18 + $0x10] sm:$0xff] }
0x12d6   :  { %v2630_v6 = vmul.f32 0.7978846, %v2628_v4  ;;  %v2627_v7 = vadd.f32 %v2625_v5, %v2611_v63  ;;  %v3072_v63 = vld [vmem:[%s4260_s17] ss:$0 sm:$0xff] }
0x12d7   :  { %v3074_v4 = vld [vmem:[%s4261_s19] ss:$0 sm:$0xff] }
0x12d8   :  { %3538 = vtanh.f32 %v2630_v6  ;;  %v2629_v8 = vmul.f32 0.7978846, %v2627_v7 }
0x12da   :  { %3540 = vtanh.f32 %v2629_v8 }
0x12e5   :  { %v3539_v9 = vpop.eup %3538 }
0x12e6   :  { %v2634_v11 = vadd.f32 1.0, %v3539_v9 }
0x12e7   :  { %v3541_v10 = vpop.eup %3540 }
0x12e8   :  { %v2633_v13 = vadd.f32 1.0, %v3541_v10  ;;  %v2636_v16 = vmul.f32 %v2634_v11, %v2620_v14 }
0x12ea   :  { %v2635_v15 = vmul.f32 %v2633_v13, %v2619_v12 }
0x12ec   :  { %3419 = vmatprep.mubr.msk.f32.mxu0 %vm1317_vm4, %v2635_v15 }
0x12ed   :  { %3420 = vmatmul.mubr.msk.f32.vlgmr.msra.gmra.mxu0 %vm1317_vm4, %v2636_v16 }
0x13ad   :  { %v3421_v46 = vpop.f32.mrf.mxu0 }
0x13ae   :  { %v2732_v33 = vadd.f32 %v3421_v46, %v3065_v41 }
0x13af   :  { %v2726_v31 = vpop.f32.mrf.mxu0 }
0x13b0   :  { %v2736_v17 = vadd.f32 %v2732_v33, %v2524_v42  ;;  %v2727_v18 = vadd.f32 %v3065_v41, %v2726_v31 }
0x13b2   :  { %v2735_v19 = vadd.f32 %v2727_v18, %v2523_v39  ;;  %v2744_v20 = vsel %vm69_vm0, %v2736_v17, 0.0 }
0x13b3   :  { %2745 = vadd.xlane.f32.xlu0 %v2744_v20 }
0x13b4   :  { %v2741_v21 = vsel %vm69_vm0, %v2735_v19, 0.0 }
0x13b5   :  { %2742 = vadd.xlane.f32.xlu1 %v2741_v21 }
0x143c   :  { %v2746_v22 = vpop.xlane.xlu0 %2745 }
0x143d   :  { %v2748_v23 = vmul.f32 0.03125, %v2746_v22 }
0x143e   :  { %v2743_v24 = vpop.xlane.xlu1 %2742 }
0x143f   :  { %v2750_v47 = vsub.f32 %v2736_v17, %v2748_v23  ;;  %v2747_v45 = vmul.f32 0.03125, %v2743_v24 }
0x1441   :  { %v2749_v56 = vsub.f32 %v2735_v19, %v2747_v45  ;;  %v2752_v62 = vmul.f32 %v2750_v47, %v2750_v47 }
0x1443   :  { %v2756_v25 = vsel %vm69_vm0, %v2752_v62, 0.0  ;;  %v2751_v26 = vmul.f32 %v2749_v56, %v2749_v56 }
0x1444   :  { %2757 = vadd.xlane.f32.xlu0 %v2756_v25 }
0x1445   :  { %v2753_v27 = vsel %vm69_vm0, %v2751_v26, 0.0 }
0x1446   :  { %2754 = vadd.xlane.f32.xlu1 %v2753_v27 }
0x14cd   :  { %v2758_v54 = vpop.xlane.xlu0 %2757 }
0x14ce   :  { %v2760_v57 = vmul.f32 0.03125, %v2758_v54 }
0x14cf   :  { %v2755_v35 = vpop.xlane.xlu1 %2754 }
0x14d0   :  { %v2762_v36 = vadd.f32 1e-05, %v2760_v57  ;;  %v2759_v37 = vmul.f32 0.03125, %v2755_v35 }
0x14d2   :  { %3542 = vrsqrt.f32 %v2762_v36  ;;  %v2761_v38 = vadd.f32 1e-05, %v2759_v37 }
0x14d4   :  { %3544 = vrsqrt.f32 %v2761_v38 }
0x14df   :  { %v3543_v39 = vpop.eup %3542 }
0x14e0   :  { %v2766_v42 = vmul.f32 %v3543_v39, %v2750_v47 }
0x14e1   :  { %v3545_v43 = vpop.eup %3544 }
0x14e2   :  { %v2765_v48 = vmul.f32 %v3545_v43, %v2749_v56  ;;  %v2774_v49 = vmul.f32 %v3070_v40, %v2766_v42 }
0x14e4   :  { %v2773_v50 = vmul.f32 %v3070_v40, %v2765_v48  ;;  %v2782_v51 = vadd.f32 %v3071_v44, %v2774_v49 }
0x14e6   :  { %v2781_v52 = vadd.f32 %v3071_v44, %v2773_v50  ;;  %v2784_v53 = vrot.slane %v2782_v51, 7 }
0x14e8   :  { %v2787_v55 = vsel %vm2786_vm6, %v2781_v52, %v2784_v53 }
0x14e9   :  { %3431 = vmatmul.mubr.msk.f32.vlgmr.msra.gmra.mxu1 %vm69_vm0, %v2787_v55 }
0x14ea   :  { %3441 = vmatprep.mubr.msk.f32.mxu1 %vm3557_vm5, %v3556_v28  ;;  %3434 = vmatpush3.msra.mxu1 %v2876_v58 }
0x14eb   :  { %3435 = vmatprep.subr.mxu1 %v3556_v28 }
0x14ec   :  { %3436 = vmatpush3.msra.mxu1 %v2875_v59 }
0x14ed   :  { %3437 = vmatprep.subr.mxu1 %v3556_v28 }
0x14ee   :  { %3438 = vmatpush3.msra.mxu1 %v2874_v60 }
0x14ef   :  { %3439 = vmatprep.subr.mxu1 %v3556_v28 }
0x14f0   :  { %3440 = vmatpush3.msra.mxu1 %v2873_v61 }
0x15a9   :  { %v2868_v0 = vpop.f32.mrf.mxu1 }
0x15aa   :  { %v2869_v1 = vadd.f32 %v3072_v63, %v2868_v0 }
0x15ab   :  { %v3432_v2 = vpop.f32.mrf.mxu1 }
0x15ac   :  { %3546 = vtanh.f32 %v2869_v1 }
0x15b9   :  { %v3547_v3 = vpop.eup %3546 }
0x15ba   :  { %3442 = vmatmul.mubr.msk.f32.vlgmr.msra.gmra.mxu1 %vm69_vm0, %v3547_v3 }
0x167a   :  { %v2953_v5 = vpop.f32.mrf.mxu1 }
0x167b   :  { %v2954_v6 = vadd.f32 %v3074_v4, %v2953_v5 }
0x167c   :  { %v3443_v7 = vpop.f32.mrf.mxu1 }
0x167d   :  { %2957 = vst [vmem:[%s4262_s20] sm:$0x3] %v2954_v6 }

</bundles_post_ra>
